<compile_context>
chip_gen: v6e
topology: v6e:2x2x1
jax: 0.10.0
libtpu: 0.0.40
codegen_flags: <defaults>
</compile_context>

<pallas_src>
import functools

import numpy as np

import jax
import jax.numpy as jnp
from jax.experimental import pallas as pl
from jax.experimental.pallas import tpu as pltpu


# ----------------------------------------------------------------------------
# Fused Pallas kernel: 3 convs + residual + global-avg-pool + dropout + fc
# ----------------------------------------------------------------------------

def _fused_forward_kernel(H, W, CW,
                          xp_ref, w1_ref, b1_ref, w2_ref, b2_ref, w3_ref,
                          b3_ref, pool_ref, fcw_ref, fcb_ref, drop_ref,
                          o_ref, hpad_ref, ypad_ref):
    """One batch element per grid step.

    xp_ref   : (H+2, (W+2)*Cin) bf16  zero-padded input, fused (w, c) lanes
    w*_ref   : (3, (W+2)*Cin_l, W*CW) bf16 banded conv weights (BN folded)
    b*_ref   : (1, W*CW) f32          per-channel bias tiled along w
    pool_ref : (W*CW, CW) f32         stacked identity / (H*W)
    fcw_ref  : (CW, NCpad) f32, fcb_ref: (1, NCpad) f32
    drop_ref : (1, CW) f32            pre-scaled inverted-dropout keep mask
    o_ref    : (1, NCpad) f32
    hpad/ypad: (H+2, (W+2)*CW) bf16   padded activation scratch (lane-dense)
    """

    def conv3x3(src_ref, w_ref, bt_ref):
        # 3 matmuls (one per kernel row), K = (W+2)*Cin, output lane-dense.
        acc = jnp.dot(src_ref[0:H, :], w_ref[0],
                      preferred_element_type=jnp.float32)
        for di in (1, 2):
            acc = acc + jnp.dot(src_ref[di:di + H, :], w_ref[di],
                                preferred_element_type=jnp.float32)
        return acc + bt_ref[...]                          # (H, W*CW) f32

    def zero_halo(pad_ref):
        # Zero only the 1-pixel halo strips; interior is fully rewritten below.
        wc = (W + 2) * CW
        pad_ref[0:1, :] = jnp.zeros((1, wc), pad_ref.dtype)
        pad_ref[H + 1:H + 2, :] = jnp.zeros((1, wc), pad_ref.dtype)
        pad_ref[:, 0:CW] = jnp.zeros((H + 2, CW), pad_ref.dtype)
        pad_ref[:, (W + 1) * CW:(W + 2) * CW] = jnp.zeros((H + 2, CW),
                                                          pad_ref.dtype)

    # --- stem: conv3x3 + (folded) BN + ReLU --------------------------------
    h2d = jnp.maximum(conv3x3(xp_ref, w1_ref, b1_ref), 0.0)   # (H, W*CW) f32

    zero_halo(hpad_ref)
    hpad_ref[1:1 + H, CW:CW + W * CW] = h2d.astype(hpad_ref.dtype)

    # --- BasicBlock conv1: conv + BN + ReLU --------------------------------
    y2d = jnp.maximum(conv3x3(hpad_ref, w2_ref, b2_ref), 0.0)

    zero_halo(ypad_ref)
    ypad_ref[1:1 + H, CW:CW + W * CW] = y2d.astype(ypad_ref.dtype)

    # --- BasicBlock conv2: conv + BN, + skip (stem output), ReLU -----------
    z2d = jnp.maximum(conv3x3(ypad_ref, w3_ref, b3_ref) + h2d, 0.0)

    # --- global average pool (sublane reduce + stacked-identity matmul) ----
    col_sum = jnp.sum(z2d, axis=0, keepdims=True)              # (1, W*CW)
    pooled = jnp.dot(col_sum, pool_ref[...],
                     preferred_element_type=jnp.float32)        # (1, CW)

    # --- dropout (pre-scaled keep mask) + fc head ---------------------------
    vec = pooled * drop_ref[...]                                # (1, CW)
    logits = jnp.dot(vec, fcw_ref[...],
                     preferred_element_type=jnp.float32) + fcb_ref[...]
    o_ref[...] = logits.astype(o_ref.dtype)


# ----------------------------------------------------------------------------
# Host-side weight packing
# ----------------------------------------------------------------------------

def _banded_conv_weights(taps, W):
    """taps (3,3,Cin,Cout) -> (3, (W+2)*Cin, W*Cout) banded (Toeplitz) mats.

    R[di, (w+dj)*Cin + c, w*Cout + o] = taps[di, dj, c, o]; zero elsewhere.
    Multiplying the fused padded row-window (H, (W+2)*Cin) by R[di] and summing
    over di yields the full 3x3 'same' convolution in (H, W*Cout) layout.
    """
    t = np.asarray(taps, np.float32)
    _, _, cin, cout = t.shape
    r = np.zeros((3, (W + 2) * cin, W * cout), np.float32)
    for di in range(3):
        for dj in range(3):
            for w in range(W):
                r[di, (w + dj) * cin:(w + dj + 1) * cin,
                  w * cout:(w + 1) * cout] = t[di, dj]
    return r


def init_params(key, cin=4, width=16, num_classes=10, eps=1e-5):
    """Deterministic synthetic weights; BN (eval stats) folded into conv taps."""
    ks = jax.random.split(key, 4)

    def conv_taps(k, ci, co):
        # PyTorch conv weight (Cout, Cin, kh, kw) -> (kh, kw, Cin, Cout)
        w = jax.random.normal(k, (co, ci, 3, 3), jnp.float32) * 0.1
        return jnp.transpose(w, (2, 3, 1, 0))

    params = {}
    for name, k, ci, co in (("1", ks[0], cin, width),
                            ("2", ks[1], width, width),
                            ("3", ks[2], width, width)):
        taps = conv_taps(k, ci, co)
        gamma = jnp.ones((co,), jnp.float32)
        beta = jnp.zeros((co,), jnp.float32)
        running_mean = jnp.zeros((co,), jnp.float32)
        running_var = jnp.ones((co,), jnp.float32)
        scale = gamma / jnp.sqrt(running_var + eps)
        params["taps" + name] = taps * scale[None, None, None, :]
        params["b" + name] = beta - running_mean * scale
    params["fc_w"] = jax.random.normal(ks[3], (width, num_classes),
                                       jnp.float32) * 0.1
    params["fc_b"] = jnp.zeros((num_classes,), jnp.float32)
    return params


# ----------------------------------------------------------------------------
# Wrapper
# ----------------------------------------------------------------------------

def resnet_with_dropout_forward(x_nchw, params, *, dropout_p=0.5,
                                training=True, seed=0):
    B, Cin, H, W = x_nchw.shape
    CW = params["taps2"].shape[-1]
    NC = params["fc_w"].shape[-1]
    ncp = ((NC + 127) // 128) * 128          # lane-dense logits, sliced below

    # NCHW (PyTorch) -> NHWC, zero-pad spatially, fuse (w, c) into lanes,
    # cast to bf16 once (MXU operand dtype).
    x = jnp.transpose(x_nchw, (0, 2, 3, 1)).astype(jnp.float32)
    xp = jnp.pad(x, ((0, 0), (1, 1), (1, 1), (0, 0)))
    xp2d = xp.reshape(B, H + 2, (W + 2) * Cin).astype(jnp.bfloat16)

    # Banded conv weights (host-side, concrete arrays).
    w1b = jnp.asarray(_banded_conv_weights(params["taps1"], W), jnp.bfloat16)
    w2b = jnp.asarray(_banded_conv_weights(params["taps2"], W), jnp.bfloat16)
    w3b = jnp.asarray(_banded_conv_weights(params["taps3"], W), jnp.bfloat16)
    b1t = jnp.tile(params["b1"].reshape(1, CW), (1, W)).astype(jnp.float32)
    b2t = jnp.tile(params["b2"].reshape(1, CW), (1, W)).astype(jnp.float32)
    b3t = jnp.tile(params["b3"].reshape(1, CW), (1, W)).astype(jnp.float32)
    pool_w = jnp.asarray(
        np.tile(np.eye(CW, dtype=np.float32), (W, 1)) / float(H * W))
    fcw = jnp.pad(params["fc_w"].astype(jnp.float32), ((0, 0), (0, ncp - NC)))
    fcb = jnp.pad(params["fc_b"].astype(jnp.float32).reshape(1, NC),
                  ((0, 0), (0, ncp - NC)))

    # Dropout keep/scale tensor (inverted dropout, PyTorch semantics).
    # TODO(synk): move to in-kernel pltpu.prng_* on real hardware.
    p = float(dropout_p)
    if training and p > 0.0:
        if p >= 1.0:
            drop = jnp.zeros((B, CW), jnp.float32)
        else:
            keep = jax.random.bernoulli(jax.random.PRNGKey(seed), 1.0 - p,
                                        (B, CW))
            drop = keep.astype(jnp.float32) * (1.0 / (1.0 - p))
    else:
        drop = jnp.ones((B, CW), jnp.float32)
    drop = drop.reshape(B, 1, CW)

    kernel = functools.partial(_fused_forward_kernel, H, W, CW)

    out = pl.pallas_call(
        kernel,
        out_shape=jax.ShapeDtypeStruct((B, 1, ncp), jnp.float32),
        grid=(B,),
        in_specs=[
            pl.BlockSpec((None, H + 2, (W + 2) * Cin), lambda b: (b, 0, 0)),
            pl.BlockSpec(w1b.shape, lambda b: (0, 0, 0)),
            pl.BlockSpec(b1t.shape, lambda b: (0, 0)),
            pl.BlockSpec(w2b.shape, lambda b: (0, 0, 0)),
            pl.BlockSpec(b2t.shape, lambda b: (0, 0)),
            pl.BlockSpec(w3b.shape, lambda b: (0, 0, 0)),
            pl.BlockSpec(b3t.shape, lambda b: (0, 0)),
            pl.BlockSpec(pool_w.shape, lambda b: (0, 0)),
            pl.BlockSpec(fcw.shape, lambda b: (0, 0)),
            pl.BlockSpec(fcb.shape, lambda b: (0, 0)),
            pl.BlockSpec((None, 1, CW), lambda b: (b, 0, 0)),
        ],
        out_specs=pl.BlockSpec((None, 1, ncp), lambda b: (b, 0, 0)),
        scratch_shapes=[
            pltpu.VMEM((H + 2, (W + 2) * CW), jnp.bfloat16),  # padded stem act
            pltpu.VMEM((H + 2, (W + 2) * CW), jnp.bfloat16),  # padded mid act
        ],
        compiler_params=pltpu.CompilerParams(
            dimension_semantics=("parallel",),
            vmem_limit_bytes=8 * 1024 * 1024),
    )(xp2d, w1b, b1t, w2b, b2t, w3b, b3t, pool_w, fcw, fcb, drop)

    return out.reshape(B, ncp)[:, :NC]


# ----------------------------------------------------------------------------
# Pure-JAX reference (eval mode) for a numeric sanity check
# ----------------------------------------------------------------------------

def reference_forward_eval(x_nchw, params):
    x = jnp.transpose(x_nchw, (0, 2, 3, 1)).astype(jnp.float32)

    def conv_bn(h, taps, bias):
        out = jax.lax.conv_general_dilated(
            h, taps, window_strides=(1, 1), padding="SAME",
            dimension_numbers=("NHWC", "HWIO", "NHWC"))
        return out + bias[None, None, None, :]

    h = jnp.maximum(conv_bn(x, params["taps1"], params["b1"]), 0.0)
    y = jnp.maximum(conv_bn(h, params["taps2"], params["b2"]), 0.0)
    z = jnp.maximum(conv_bn(y, params["taps3"], params["b3"]) + h, 0.0)
    pooled = jnp.mean(z, axis=(1, 2))
    return pooled @ params["fc_w"] + params["fc_b"][None, :]


# ----------------------------------------------------------------------------
# main
# ----------------------------------------------------------------------------

if __name__ == "__main__":
    key = jax.random.PRNGKey(0)
    k_x, k_p = jax.random.split(key)

    B, Cin, Hs, Ws = 2, 4, 16, 16
    num_classes = 10
    x = jax.random.normal(k_x, (B, Cin, Hs, Ws), jnp.float32)
    params = init_params(k_p, cin=Cin, width=16, num_classes=num_classes)

    # Training-mode run (dropout active) -- the "real" forward.
    logits = resnet_with_dropout_forward(
        x, params, dropout_p=0.5, training=True, seed=0)
    logits = jax.block_until_ready(logits)
    assert logits.shape == (B, num_classes), logits.shape
    assert bool(jnp.all(jnp.isfinite(logits)))

    # Eval-mode run vs pure-JAX reference (loose tol: bf16 MXU operands).
    eval_logits = jax.block_until_ready(
        resnet_with_dropout_forward(x, params, dropout_p=0.5, training=False))
    ref_logits = reference_forward_eval(x, params)
    max_err = float(jnp.max(jnp.abs(eval_logits - ref_logits)))
    assert max_err < 5e-2, f"max abs err vs reference: {max_err}"

    print("KERNEL_OK")
</pallas_src>

<mosaic_0001>
module attributes {stable_mosaic.version = 11 : i64} {
  func.func @_fused_forward_kernel(%arg0: i32, %arg1: memref<1x18x72xbf16, #tpu.memory_space<vmem>>, %arg2: memref<3x72x256xbf16, #tpu.memory_space<vmem>>, %arg3: memref<1x256xf32, #tpu.memory_space<vmem>>, %arg4: memref<3x288x256xbf16, #tpu.memory_space<vmem>>, %arg5: memref<1x256xf32, #tpu.memory_space<vmem>>, %arg6: memref<3x288x256xbf16, #tpu.memory_space<vmem>>, %arg7: memref<1x256xf32, #tpu.memory_space<vmem>>, %arg8: memref<256x16xf32, #tpu.memory_space<vmem>>, %arg9: memref<16x128xf32, #tpu.memory_space<vmem>>, %arg10: memref<1x128xf32, #tpu.memory_space<vmem>>, %arg11: memref<1x1x16xf32, #tpu.memory_space<vmem>>, %arg12: memref<1x1x128xf32, #tpu.memory_space<vmem>>, %arg13: memref<18x288xbf16, #tpu.memory_space<vmem>>, %arg14: memref<18x288xbf16, #tpu.memory_space<vmem>>) attributes {dimension_semantics = [#tpu.dimension_semantics<parallel>], iteration_bounds = array<i64: 2>, scalar_prefetch = 0 : i64, scratch_operands = 2 : i64, tpu.core_type = #tpu.core_type<tc>, window_params = [{transform_indices = @transform_0, window_bounds = array<i64: 1, 18, 72>}, {pipeline_mode = #tpu.pipeline_mode<synchronous>, transform_indices = @transform_1, window_bounds = array<i64: 3, 72, 256>}, {pipeline_mode = #tpu.pipeline_mode<synchronous>, transform_indices = @transform_2, window_bounds = array<i64: 1, 256>}, {pipeline_mode = #tpu.pipeline_mode<synchronous>, transform_indices = @transform_3, window_bounds = array<i64: 3, 288, 256>}, {pipeline_mode = #tpu.pipeline_mode<synchronous>, transform_indices = @transform_4, window_bounds = array<i64: 1, 256>}, {pipeline_mode = #tpu.pipeline_mode<synchronous>, transform_indices = @transform_5, window_bounds = array<i64: 3, 288, 256>}, {pipeline_mode = #tpu.pipeline_mode<synchronous>, transform_indices = @transform_6, window_bounds = array<i64: 1, 256>}, {pipeline_mode = #tpu.pipeline_mode<synchronous>, transform_indices = @transform_7, window_bounds = array<i64: 256, 16>}, {pipeline_mode = #tpu.pipeline_mode<synchronous>, transform_indices = @transform_8, window_bounds = array<i64: 16, 128>}, {pipeline_mode = #tpu.pipeline_mode<synchronous>, transform_indices = @transform_9, window_bounds = array<i64: 1, 128>}, {transform_indices = @transform_10, window_bounds = array<i64: 1, 1, 16>}, {transform_indices = @transform_11, window_bounds = array<i64: 1, 1, 128>}]} {
    %c0 = arith.constant 0 : index
    %c0_0 = arith.constant 0 : index
    %c0_1 = arith.constant 0 : index
    %0 = vector.load %arg1[%c0, %c0_0, %c0_1] : memref<1x18x72xbf16, #tpu.memory_space<vmem>>, vector<1x16x72xbf16>
    %1 = vector.shape_cast %0 : vector<1x16x72xbf16> to vector<16x72xbf16>
    %c0_2 = arith.constant 0 : index
    %c0_3 = arith.constant 0 : index
    %c0_4 = arith.constant 0 : index
    %2 = vector.load %arg2[%c0_2, %c0_3, %c0_4] : memref<3x72x256xbf16, #tpu.memory_space<vmem>>, vector<1x72x256xbf16>
    %3 = vector.shape_cast %2 : vector<1x72x256xbf16> to vector<72x256xbf16>
    %cst = arith.constant dense<0.000000e+00> : vector<16x256xf32>
    %4 = tpu.matmul %1, %3, %cst {dimension_numbers = #tpu.dot_dimension_numbers<[1], [0], [0], [1], [0, 0, 1, 1], [], []>} : vector<16x72xbf16>, vector<72x256xbf16>, vector<16x256xf32> -> vector<16x256xf32>
    %c0_5 = arith.constant 0 : index
    %c1 = arith.constant 1 : index
    %c0_6 = arith.constant 0 : index
    %5 = vector.load %arg1[%c0_5, %c1, %c0_6] : memref<1x18x72xbf16, #tpu.memory_space<vmem>>, vector<1x16x72xbf16>
    %6 = vector.shape_cast %5 : vector<1x16x72xbf16> to vector<16x72xbf16>
    %c1_7 = arith.constant 1 : index
    %c0_8 = arith.constant 0 : index
    %c0_9 = arith.constant 0 : index
    %7 = vector.load %arg2[%c1_7, %c0_8, %c0_9] : memref<3x72x256xbf16, #tpu.memory_space<vmem>>, vector<1x72x256xbf16>
    %8 = vector.shape_cast %7 : vector<1x72x256xbf16> to vector<72x256xbf16>
    %cst_10 = arith.constant dense<0.000000e+00> : vector<16x256xf32>
    %9 = tpu.matmul %6, %8, %cst_10 {dimension_numbers = #tpu.dot_dimension_numbers<[1], [0], [0], [1], [0, 0, 1, 1], [], []>} : vector<16x72xbf16>, vector<72x256xbf16>, vector<16x256xf32> -> vector<16x256xf32>
    %10 = arith.addf %4, %9 : vector<16x256xf32>
    %c0_11 = arith.constant 0 : index
    %c2 = arith.constant 2 : index
    %c0_12 = arith.constant 0 : index
    %11 = vector.load %arg1[%c0_11, %c2, %c0_12] : memref<1x18x72xbf16, #tpu.memory_space<vmem>>, vector<1x16x72xbf16>
    %12 = vector.shape_cast %11 : vector<1x16x72xbf16> to vector<16x72xbf16>
    %c2_13 = arith.constant 2 : index
    %c0_14 = arith.constant 0 : index
    %c0_15 = arith.constant 0 : index
    %13 = vector.load %arg2[%c2_13, %c0_14, %c0_15] : memref<3x72x256xbf16, #tpu.memory_space<vmem>>, vector<1x72x256xbf16>
    %14 = vector.shape_cast %13 : vector<1x72x256xbf16> to vector<72x256xbf16>
    %cst_16 = arith.constant dense<0.000000e+00> : vector<16x256xf32>
    %15 = tpu.matmul %12, %14, %cst_16 {dimension_numbers = #tpu.dot_dimension_numbers<[1], [0], [0], [1], [0, 0, 1, 1], [], []>} : vector<16x72xbf16>, vector<72x256xbf16>, vector<16x256xf32> -> vector<16x256xf32>
    %16 = arith.addf %10, %15 : vector<16x256xf32>
    %c0_17 = arith.constant 0 : index
    %c0_18 = arith.constant 0 : index
    %17 = vector.load %arg3[%c0_17, %c0_18] : memref<1x256xf32, #tpu.memory_space<vmem>>, vector<1x256xf32>
    %18 = vector.broadcast %17 : vector<1x256xf32> to vector<16x256xf32>
    %19 = arith.addf %16, %18 : vector<16x256xf32>
    %cst_19 = arith.constant 0.000000e+00 : f32
    %20 = vector.broadcast %cst_19 : f32 to vector<16x256xf32>
    %21 = arith.maximumf %19, %20 : vector<16x256xf32>
    %cst_20 = arith.constant 0.000000e+00 : bf16
    %22 = vector.broadcast %cst_20 : bf16 to vector<1x288xbf16>
    %c0_21 = arith.constant 0 : index
    %c0_22 = arith.constant 0 : index
    %23 = vector.load %arg13[%c0_21, %c0_22] : memref<18x288xbf16, #tpu.memory_space<vmem>>, vector<1x288xbf16>
    tpu.vector_store %arg13[%c0_21, %c0_22], %22 {strides = array<i32>} : memref<18x288xbf16, #tpu.memory_space<vmem>>, vector<1x288xbf16>,
    %cst_23 = arith.constant 0.000000e+00 : bf16
    %24 = vector.broadcast %cst_23 : bf16 to vector<1x288xbf16>
    %c17 = arith.constant 17 : index
    %c0_24 = arith.constant 0 : index
    %25 = vector.load %arg13[%c17, %c0_24] : memref<18x288xbf16, #tpu.memory_space<vmem>>, vector<1x288xbf16>
    tpu.vector_store %arg13[%c17, %c0_24], %24 {strides = array<i32>} : memref<18x288xbf16, #tpu.memory_space<vmem>>, vector<1x288xbf16>,
    %cst_25 = arith.constant 0.000000e+00 : bf16
    %26 = vector.broadcast %cst_25 : bf16 to vector<18x16xbf16>
    %c0_26 = arith.constant 0 : index
    %c0_27 = arith.constant 0 : index
    %27 = vector.load %arg13[%c0_26, %c0_27] : memref<18x288xbf16, #tpu.memory_space<vmem>>, vector<18x16xbf16>
    tpu.vector_store %arg13[%c0_26, %c0_27], %26 {strides = array<i32>} : memref<18x288xbf16, #tpu.memory_space<vmem>>, vector<18x16xbf16>,
    %cst_28 = arith.constant 0.000000e+00 : bf16
    %28 = vector.broadcast %cst_28 : bf16 to vector<18x16xbf16>
    %c0_29 = arith.constant 0 : index
    %c272 = arith.constant 272 : index
    %29 = vector.load %arg13[%c0_29, %c272] : memref<18x288xbf16, #tpu.memory_space<vmem>>, vector<18x16xbf16>
    tpu.vector_store %arg13[%c0_29, %c272], %28 {strides = array<i32>} : memref<18x288xbf16, #tpu.memory_space<vmem>>, vector<18x16xbf16>,
    %30 = arith.truncf %21 : vector<16x256xf32> to vector<16x256xbf16>
    %c1_30 = arith.constant 1 : index
    %c16 = arith.constant 16 : index
    %31 = vector.load %arg13[%c1_30, %c16] : memref<18x288xbf16, #tpu.memory_space<vmem>>, vector<16x256xbf16>
    tpu.vector_store %arg13[%c1_30, %c16], %30 {strides = array<i32>} : memref<18x288xbf16, #tpu.memory_space<vmem>>, vector<16x256xbf16>,
    %c0_31 = arith.constant 0 : index
    %c0_32 = arith.constant 0 : index
    %32 = vector.load %arg13[%c0_31, %c0_32] : memref<18x288xbf16, #tpu.memory_space<vmem>>, vector<16x288xbf16>
    %c0_33 = arith.constant 0 : index
    %c0_34 = arith.constant 0 : index
    %c0_35 = arith.constant 0 : index
    %33 = vector.load %arg4[%c0_33, %c0_34, %c0_35] : memref<3x288x256xbf16, #tpu.memory_space<vmem>>, vector<1x288x256xbf16>
    %34 = vector.shape_cast %33 : vector<1x288x256xbf16> to vector<288x256xbf16>
    %cst_36 = arith.constant dense<0.000000e+00> : vector<16x256xf32>
    %35 = tpu.matmul %32, %34, %cst_36 {dimension_numbers = #tpu.dot_dimension_numbers<[1], [0], [0], [1], [0, 0, 1, 1], [], []>} : vector<16x288xbf16>, vector<288x256xbf16>, vector<16x256xf32> -> vector<16x256xf32>
    %c1_37 = arith.constant 1 : index
    %c0_38 = arith.constant 0 : index
    %36 = vector.load %arg13[%c1_37, %c0_38] : memref<18x288xbf16, #tpu.memory_space<vmem>>, vector<16x288xbf16>
    %c1_39 = arith.constant 1 : index
    %c0_40 = arith.constant 0 : index
    %c0_41 = arith.constant 0 : index
    %37 = vector.load %arg4[%c1_39, %c0_40, %c0_41] : memref<3x288x256xbf16, #tpu.memory_space<vmem>>, vector<1x288x256xbf16>
    %38 = vector.shape_cast %37 : vector<1x288x256xbf16> to vector<288x256xbf16>
    %cst_42 = arith.constant dense<0.000000e+00> : vector<16x256xf32>
    %39 = tpu.matmul %36, %38, %cst_42 {dimension_numbers = #tpu.dot_dimension_numbers<[1], [0], [0], [1], [0, 0, 1, 1], [], []>} : vector<16x288xbf16>, vector<288x256xbf16>, vector<16x256xf32> -> vector<16x256xf32>
    %40 = arith.addf %35, %39 : vector<16x256xf32>
    %c2_43 = arith.constant 2 : index
    %c0_44 = arith.constant 0 : index
    %41 = vector.load %arg13[%c2_43, %c0_44] : memref<18x288xbf16, #tpu.memory_space<vmem>>, vector<16x288xbf16>
    %c2_45 = arith.constant 2 : index
    %c0_46 = arith.constant 0 : index
    %c0_47 = arith.constant 0 : index
    %42 = vector.load %arg4[%c2_45, %c0_46, %c0_47] : memref<3x288x256xbf16, #tpu.memory_space<vmem>>, vector<1x288x256xbf16>
    %43 = vector.shape_cast %42 : vector<1x288x256xbf16> to vector<288x256xbf16>
    %cst_48 = arith.constant dense<0.000000e+00> : vector<16x256xf32>
    %44 = tpu.matmul %41, %43, %cst_48 {dimension_numbers = #tpu.dot_dimension_numbers<[1], [0], [0], [1], [0, 0, 1, 1], [], []>} : vector<16x288xbf16>, vector<288x256xbf16>, vector<16x256xf32> -> vector<16x256xf32>
    %45 = arith.addf %40, %44 : vector<16x256xf32>
    %c0_49 = arith.constant 0 : index
    %c0_50 = arith.constant 0 : index
    %46 = vector.load %arg5[%c0_49, %c0_50] : memref<1x256xf32, #tpu.memory_space<vmem>>, vector<1x256xf32>
    %47 = vector.broadcast %46 : vector<1x256xf32> to vector<16x256xf32>
    %48 = arith.addf %45, %47 : vector<16x256xf32>
    %cst_51 = arith.constant 0.000000e+00 : f32
    %49 = vector.broadcast %cst_51 : f32 to vector<16x256xf32>
    %50 = arith.maximumf %48, %49 : vector<16x256xf32>
    %cst_52 = arith.constant 0.000000e+00 : bf16
    %51 = vector.broadcast %cst_52 : bf16 to vector<1x288xbf16>
    %c0_53 = arith.constant 0 : index
    %c0_54 = arith.constant 0 : index
    %52 = vector.load %arg14[%c0_53, %c0_54] : memref<18x288xbf16, #tpu.memory_space<vmem>>, vector<1x288xbf16>
    tpu.vector_store %arg14[%c0_53, %c0_54], %51 {strides = array<i32>} : memref<18x288xbf16, #tpu.memory_space<vmem>>, vector<1x288xbf16>,
    %cst_55 = arith.constant 0.000000e+00 : bf16
    %53 = vector.broadcast %cst_55 : bf16 to vector<1x288xbf16>
    %c17_56 = arith.constant 17 : index
    %c0_57 = arith.constant 0 : index
    %54 = vector.load %arg14[%c17_56, %c0_57] : memref<18x288xbf16, #tpu.memory_space<vmem>>, vector<1x288xbf16>
    tpu.vector_store %arg14[%c17_56, %c0_57], %53 {strides = array<i32>} : memref<18x288xbf16, #tpu.memory_space<vmem>>, vector<1x288xbf16>,
    %cst_58 = arith.constant 0.000000e+00 : bf16
    %55 = vector.broadcast %cst_58 : bf16 to vector<18x16xbf16>
    %c0_59 = arith.constant 0 : index
    %c0_60 = arith.constant 0 : index
    %56 = vector.load %arg14[%c0_59, %c0_60] : memref<18x288xbf16, #tpu.memory_space<vmem>>, vector<18x16xbf16>
    tpu.vector_store %arg14[%c0_59, %c0_60], %55 {strides = array<i32>} : memref<18x288xbf16, #tpu.memory_space<vmem>>, vector<18x16xbf16>,
    %cst_61 = arith.constant 0.000000e+00 : bf16
    %57 = vector.broadcast %cst_61 : bf16 to vector<18x16xbf16>
    %c0_62 = arith.constant 0 : index
    %c272_63 = arith.constant 272 : index
    %58 = vector.load %arg14[%c0_62, %c272_63] : memref<18x288xbf16, #tpu.memory_space<vmem>>, vector<18x16xbf16>
    tpu.vector_store %arg14[%c0_62, %c272_63], %57 {strides = array<i32>} : memref<18x288xbf16, #tpu.memory_space<vmem>>, vector<18x16xbf16>,
    %59 = arith.truncf %50 : vector<16x256xf32> to vector<16x256xbf16>
    %c1_64 = arith.constant 1 : index
    %c16_65 = arith.constant 16 : index
    %60 = vector.load %arg14[%c1_64, %c16_65] : memref<18x288xbf16, #tpu.memory_space<vmem>>, vector<16x256xbf16>
    tpu.vector_store %arg14[%c1_64, %c16_65], %59 {strides = array<i32>} : memref<18x288xbf16, #tpu.memory_space<vmem>>, vector<16x256xbf16>,
    %c0_66 = arith.constant 0 : index
    %c0_67 = arith.constant 0 : index
    %61 = vector.load %arg14[%c0_66, %c0_67] : memref<18x288xbf16, #tpu.memory_space<vmem>>, vector<16x288xbf16>
    %c0_68 = arith.constant 0 : index
    %c0_69 = arith.constant 0 : index
    %c0_70 = arith.constant 0 : index
    %62 = vector.load %arg6[%c0_68, %c0_69, %c0_70] : memref<3x288x256xbf16, #tpu.memory_space<vmem>>, vector<1x288x256xbf16>
    %63 = vector.shape_cast %62 : vector<1x288x256xbf16> to vector<288x256xbf16>
    %cst_71 = arith.constant dense<0.000000e+00> : vector<16x256xf32>
    %64 = tpu.matmul %61, %63, %cst_71 {dimension_numbers = #tpu.dot_dimension_numbers<[1], [0], [0], [1], [0, 0, 1, 1], [], []>} : vector<16x288xbf16>, vector<288x256xbf16>, vector<16x256xf32> -> vector<16x256xf32>
    %c1_72 = arith.constant 1 : index
    %c0_73 = arith.constant 0 : index
    %65 = vector.load %arg14[%c1_72, %c0_73] : memref<18x288xbf16, #tpu.memory_space<vmem>>, vector<16x288xbf16>
    %c1_74 = arith.constant 1 : index
    %c0_75 = arith.constant 0 : index
    %c0_76 = arith.constant 0 : index
    %66 = vector.load %arg6[%c1_74, %c0_75, %c0_76] : memref<3x288x256xbf16, #tpu.memory_space<vmem>>, vector<1x288x256xbf16>
    %67 = vector.shape_cast %66 : vector<1x288x256xbf16> to vector<288x256xbf16>
    %cst_77 = arith.constant dense<0.000000e+00> : vector<16x256xf32>
    %68 = tpu.matmul %65, %67, %cst_77 {dimension_numbers = #tpu.dot_dimension_numbers<[1], [0], [0], [1], [0, 0, 1, 1], [], []>} : vector<16x288xbf16>, vector<288x256xbf16>, vector<16x256xf32> -> vector<16x256xf32>
    %69 = arith.addf %64, %68 : vector<16x256xf32>
    %c2_78 = arith.constant 2 : index
    %c0_79 = arith.constant 0 : index
    %70 = vector.load %arg14[%c2_78, %c0_79] : memref<18x288xbf16, #tpu.memory_space<vmem>>, vector<16x288xbf16>
    %c2_80 = arith.constant 2 : index
    %c0_81 = arith.constant 0 : index
    %c0_82 = arith.constant 0 : index
    %71 = vector.load %arg6[%c2_80, %c0_81, %c0_82] : memref<3x288x256xbf16, #tpu.memory_space<vmem>>, vector<1x288x256xbf16>
    %72 = vector.shape_cast %71 : vector<1x288x256xbf16> to vector<288x256xbf16>
    %cst_83 = arith.constant dense<0.000000e+00> : vector<16x256xf32>
    %73 = tpu.matmul %70, %72, %cst_83 {dimension_numbers = #tpu.dot_dimension_numbers<[1], [0], [0], [1], [0, 0, 1, 1], [], []>} : vector<16x288xbf16>, vector<288x256xbf16>, vector<16x256xf32> -> vector<16x256xf32>
    %74 = arith.addf %69, %73 : vector<16x256xf32>
    %c0_84 = arith.constant 0 : index
    %c0_85 = arith.constant 0 : index
    %75 = vector.load %arg7[%c0_84, %c0_85] : memref<1x256xf32, #tpu.memory_space<vmem>>, vector<1x256xf32>
    %76 = vector.broadcast %75 : vector<1x256xf32> to vector<16x256xf32>
    %77 = arith.addf %74, %76 : vector<16x256xf32>
    %78 = arith.addf %77, %21 : vector<16x256xf32>
    %cst_86 = arith.constant 0.000000e+00 : f32
    %79 = vector.broadcast %cst_86 : f32 to vector<16x256xf32>
    %80 = arith.maximumf %78, %79 : vector<16x256xf32>
    %cst_87 = arith.constant dense<0.000000e+00> : vector<256xf32>
    %81 = vector.multi_reduction <add>, %80, %cst_87 [0] : vector<16x256xf32> to vector<256xf32>
    %82 = vector.shape_cast %81 : vector<256xf32> to vector<1x256xf32>
    %c0_88 = arith.constant 0 : index
    %c0_89 = arith.constant 0 : index
    %83 = vector.load %arg8[%c0_88, %c0_89] : memref<256x16xf32, #tpu.memory_space<vmem>>, vector<256x16xf32>
    %cst_90 = arith.constant dense<0.000000e+00> : vector<1x16xf32>
    %84 = tpu.matmul %82, %83, %cst_90 {dimension_numbers = #tpu.dot_dimension_numbers<[1], [0], [0], [1], [0, 0, 1, 1], [], []>} : vector<1x256xf32>, vector<256x16xf32>, vector<1x16xf32> -> vector<1x16xf32>
    %c0_91 = arith.constant 0 : index
    %c0_92 = arith.constant 0 : index
    %c0_93 = arith.constant 0 : index
    %85 = vector.load %arg11[%c0_91, %c0_92, %c0_93] : memref<1x1x16xf32, #tpu.memory_space<vmem>>, vector<1x1x16xf32>
    %86 = vector.shape_cast %85 : vector<1x1x16xf32> to vector<1x16xf32>
    %87 = arith.mulf %84, %86 : vector<1x16xf32>
    %c0_94 = arith.constant 0 : index
    %c0_95 = arith.constant 0 : index
    %88 = vector.load %arg9[%c0_94, %c0_95] : memref<16x128xf32, #tpu.memory_space<vmem>>, vector<16x128xf32>
    %cst_96 = arith.constant dense<0.000000e+00> : vector<1x128xf32>
    %89 = tpu.matmul %87, %88, %cst_96 {dimension_numbers = #tpu.dot_dimension_numbers<[1], [0], [0], [1], [0, 0, 1, 1], [], []>} : vector<1x16xf32>, vector<16x128xf32>, vector<1x128xf32> -> vector<1x128xf32>
    %c0_97 = arith.constant 0 : index
    %c0_98 = arith.constant 0 : index
    %90 = vector.load %arg10[%c0_97, %c0_98] : memref<1x128xf32, #tpu.memory_space<vmem>>, vector<1x128xf32>
    %91 = arith.addf %89, %90 : vector<1x128xf32>
    %c0_99 = arith.constant 0 : index
    %c0_100 = arith.constant 0 : index
    %c0_101 = arith.constant 0 : index
    %92 = vector.load %arg12[%c0_99, %c0_100, %c0_101] : memref<1x1x128xf32, #tpu.memory_space<vmem>>, vector<1x1x128xf32>
    %93 = vector.shape_cast %92 : vector<1x1x128xf32> to vector<1x128xf32>
    %94 = vector.shape_cast %91 : vector<1x128xf32> to vector<1x1x128xf32>
    tpu.vector_store %arg12[%c0_99, %c0_100, %c0_101], %94 {strides = array<i32>} : memref<1x1x128xf32, #tpu.memory_space<vmem>>, vector<1x1x128xf32>,
    return
  }
  func.func @transform_0(%arg0: i32) -> (i32, i32, i32) {
    %c0_i32 = arith.constant 0 : i32
    %c0_i32_0 = arith.constant 0 : i32
    %c0_i32_1 = arith.constant 0 : i32
    return %arg0, %c0_i32, %c0_i32_0 : i32, i32, i32
  }
  func.func @transform_1(%arg0: i32) -> (i32, i32, i32) {
    %c0_i32 = arith.constant 0 : i32
    %c0_i32_0 = arith.constant 0 : i32
    %c0_i32_1 = arith.constant 0 : i32
    %c0_i32_2 = arith.constant 0 : i32
    return %c0_i32, %c0_i32_0, %c0_i32_1 : i32, i32, i32
  }
  func.func @transform_2(%arg0: i32) -> (i32, i32) {
    %c0_i32 = arith.constant 0 : i32
    %c0_i32_0 = arith.constant 0 : i32
    %c0_i32_1 = arith.constant 0 : i32
    return %c0_i32, %c0_i32_0 : i32, i32
  }
  func.func @transform_3(%arg0: i32) -> (i32, i32, i32) {
    %c0_i32 = arith.constant 0 : i32
    %c0_i32_0 = arith.constant 0 : i32
    %c0_i32_1 = arith.constant 0 : i32
    %c0_i32_2 = arith.constant 0 : i32
    return %c0_i32, %c0_i32_0, %c0_i32_1 : i32, i32, i32
  }
  func.func @transform_4(%arg0: i32) -> (i32, i32) {
    %c0_i32 = arith.constant 0 : i32
    %c0_i32_0 = arith.constant 0 : i32
    %c0_i32_1 = arith.constant 0 : i32
    return %c0_i32, %c0_i32_0 : i32, i32
  }
  func.func @transform_5(%arg0: i32) -> (i32, i32, i32) {
    %c0_i32 = arith.constant 0 : i32
    %c0_i32_0 = arith.constant 0 : i32
    %c0_i32_1 = arith.constant 0 : i32
    %c0_i32_2 = arith.constant 0 : i32
    return %c0_i32, %c0_i32_0, %c0_i32_1 : i32, i32, i32
  }
  func.func @transform_6(%arg0: i32) -> (i32, i32) {
    %c0_i32 = arith.constant 0 : i32
    %c0_i32_0 = arith.constant 0 : i32
    %c0_i32_1 = arith.constant 0 : i32
    return %c0_i32, %c0_i32_0 : i32, i32
  }
  func.func @transform_7(%arg0: i32) -> (i32, i32) {
    %c0_i32 = arith.constant 0 : i32
    %c0_i32_0 = arith.constant 0 : i32
    %c0_i32_1 = arith.constant 0 : i32
    return %c0_i32, %c0_i32_0 : i32, i32
  }
  func.func @transform_8(%arg0: i32) -> (i32, i32) {
    %c0_i32 = arith.constant 0 : i32
    %c0_i32_0 = arith.constant 0 : i32
    %c0_i32_1 = arith.constant 0 : i32
    return %c0_i32, %c0_i32_0 : i32, i32
  }
  func.func @transform_9(%arg0: i32) -> (i32, i32) {
    %c0_i32 = arith.constant 0 : i32
    %c0_i32_0 = arith.constant 0 : i32
    %c0_i32_1 = arith.constant 0 : i32
    return %c0_i32, %c0_i32_0 : i32, i32
  }
  func.func @transform_10(%arg0: i32) -> (i32, i32, i32) {
    %c0_i32 = arith.constant 0 : i32
    %c0_i32_0 = arith.constant 0 : i32
    %c0_i32_1 = arith.constant 0 : i32
    return %arg0, %c0_i32, %c0_i32_0 : i32, i32, i32
  }
  func.func @transform_11(%arg0: i32) -> (i32, i32, i32) {
    %c0_i32 = arith.constant 0 : i32
    %c0_i32_0 = arith.constant 0 : i32
    %c0_i32_1 = arith.constant 0 : i32
    return %arg0, %c0_i32, %c0_i32_0 : i32, i32, i32
  }
}

</mosaic_0001>

<bundles_post_ra>
// kernel: tpu_custom_call.1
= control target key start
LH: loop header
LB: loop body
LE: loop exit
PB: predicated region body
PF: predicated region fallthrough
CT: control target
= control target key end

     0   :  { %s4977_s0 = inlined_call_operand.vmem [shape: bf16[2,18,72], index: 0, kind: input, shape index: {}]   ;;  %s4978_s1 = inlined_call_operand.vmem [shape: bf16[3,72,256], index: 1, kind: input, shape index: {}]   ;;  %s4979_s2 = inlined_call_operand.vmem [shape: f32[1,256], index: 2, kind: input, shape index: {}]   ;;  %s4980_s3 = inlined_call_operand.hbm [shape: bf16[3,288,256], index: 3, kind: input, shape index: {}]   ;;  %s4981_s4 = inlined_call_operand.vmem [shape: f32[1,256], index: 4, kind: input, shape index: {}]   ;;  %s4982_s5 = inlined_call_operand.hbm [shape: bf16[3,288,256], index: 5, kind: input, shape index: {}]   ;;  %s4983_s6 = inlined_call_operand.vmem [shape: f32[1,256], index: 6, kind: input, shape index: {}]   ;;  %s4984_s7 = inlined_call_operand.vmem [shape: f32[256,16], index: 7, kind: input, shape index: {}]   ;;  %s4985_s8 = inlined_call_operand.vmem [shape: f32[16,128], index: 8, kind: input, shape index: {}]   ;;  %s4986_s9 = inlined_call_operand.vmem [shape: f32[1,128], index: 9, kind: input, shape index: {}]   ;;  %s4987_s10 = inlined_call_operand.vmem [shape: f32[2,1,16], index: 10, kind: input, shape index: {}]   ;;  %s4988_s11 = inlined_call_operand.hbm [shape: f32[2,1,128], index: 11, kind: output, shape index: {}]  }
   0x1   :  { %4992 = sst [smem:[#allocation14_spill]] %s4980_s3 }
   0x2   :  { %4993 = sst [smem:[#allocation15_spill]] %s4982_s5 }
   0x3   :  { %16 = vsyncpa [#allocation5], 0 }
   0x4   :  { %17 = vsyncpa [#allocation8], 0 }
   0x5   :  { %18 = vsyncpa [#allocation6], 0 }
   0x6   :  { %20 = vsyncpa [#allocation6 + $0x1], 0  ;;  %s4357_s17 = smov 0   ;;  %s4359_s18 = smov 0  }
   0x7   :  { %s4361_s19 = smov 0   ;;  %s4363_s20 = smov 0  }
   0x8 LB: > { %s4378_s21 = sadd.s32 4294967295, %s4286_s20   ;;  %s3353_s22 = sadd.s32 4294967294, %s4286_s20   ;;  %s4286_s20 = sphi %s4363_s20, %s5039_s20   ;;  %s4282_s19 = sphi %s4361_s19, %s5038_s19   ;;  %s4278_s18 = sphi %s4359_s18, %s5037_s18   ;;  %s4274_s17 = sphi %s4357_s17, %s5036_s17  }
   0x9   : > { %s4382_s23 = sadd.s32 1, %s4286_s20   ;;  %s274_s24 = sadd.s32 1, %s4282_s19 }
   0xa   : > { %s271_s25 = ssub.s32 %s4286_s20, %s4382_s23  ;;  %p284_p0 = scmp.ne.s32.totalorder %s4282_s19, %s4278_s18 }
   0xb   : > { %p272_p1 = scmp.eq.s32.totalorder %s271_s25, 0  ;;  %p285_p2 = scmp.eq.s32.totalorder %s4378_s21, 1 }
   0xc   : > { %p290_p3 = scmp.ne.s32.totalorder %s4278_s18, %s4274_s17  ;;  %p291_p4 = scmp.eq.s32.totalorder %s3353_s22, 1 }
   0xd   : > { %s4393_s26 = scalar_select %p272_p1, %s4282_s19, %s274_s24  }
   0xe   : > { %p4395_p5 = por %p285_p2, %p284_p0  ;;  %p4399_p6 = por %p291_p4, %p290_p3 }
   0xf   : > { %4994 = sst [smem:[#allocation13_spill]] %s4393_s26  ;;  %p3354_p7 = scmp.ge.s32.totalorder %s4286_s20, 1 }
  0x10   : > { %s4996_s28 = scalar_select %p4399_p6, 1, 0 }
  0x11   : > { %p298_p8 = scmp.lt.s32.totalorder %s4286_s20, 3  ;;  %p4989_p9 = scmp.eq.s32.totalorder %s4378_s21, 0 }
  0x12   : > { %s4288_s30 = smov [#allocation4]   ;;  %s4289_s14 = smov [#allocation7]  }
  0x13   : > { %p4406_p10 = pnand %p3354_p7, %p298_p8  ;;  %s316_s12 = sshll.u32 %s4288_s30, 4  ;;  %s317_s12 = int_to_ptr.vmem [resolvable:$true] %s316_s12 }
  0x14   : > { %s332_s15 = sshll.u32 %s4289_s14, 4  ;;  %s4177_s16 = scalar_lea.vmem %s317_s12, 13824  ;;  %s333_s15 = int_to_ptr.vmem [resolvable:$true] %s332_s15 }
  0x15   : > { %p3727_p11 = pneg %p4406_p10  ;;  %p4178_p0 = scmp.ne.s32.totalorder %s317_s12, %s4177_s16 }
  0x16   : > { %p4185_p3 = scmp.lt.s32.totalorder %s317_s12, %s317_s12  ;;  %p4186_p4 = scmp.lt.s32.totalorder %s4177_s16, %s4177_s16 }
  0x17   : > { %p4414_p12 = pnand %p4989_p9, %p3727_p11 }
  0x18   : > { %p4187_p7 = por %p4186_p4, %p4185_p3 }
  0x19   : > { %p4168_p13 = pneg %p4414_p12 }
  0x1b   : > { %p4180_p1 = pnand %p4178_p0, %p4168_p13 }
  0x1d   : > { %p4181_p2 = pneg %p4180_p1 }
  0x1f   : > { %p4188_p8 = pnand %p4187_p7, %p4181_p2 }
  0x21   : > { %4191 = shalt.err (!%p4188_p8)
}
  0x22   : > { %s4290_s22 = smov 128   ;;  %s4291_s24 = smov 8  }
  0x23   : > { %s4999_s3 = sld [smem:[#allocation14_spill]]  ;;  %s4203_s14 = scalar_lea.vmem %s333_s15, 13824 }
  0x24   : > { %p4204_p11 = scmp.ne.s32.totalorder %s333_s15, %s4203_s14  ;;  %p4211_p9 = scmp.lt.s32.totalorder %s333_s15, %s333_s15 }
  0x25   : > { %p4212_p6 = scmp.lt.s32.totalorder %s4203_s14, %s4203_s14 }
  0x26   : > { %p4206_p0 = pnand %p4204_p11, %p4168_p13 }
  0x27   : > { %p4213_p3 = por %p4212_p6, %p4211_p9 }
  0x28   : > { %p4207_p1 = pneg %p4206_p0 }
  0x29   : > { %3730 = dma.hbm_to_vmem [thread:$0]  (!%p4414_p12), %s4999_s3, 13824, %s317_s12, [#allocation5], %s4290_s22, %s4290_s22, %s4291_s24  }
  0x2a   : > { %p4214_p2 = pnand %p4213_p3, %p4207_p1 }
  0x2c   : > { %4217 = shalt.err (!%p4214_p2)
}
  0x2d   : > { %s5000_s5 = sld [smem:[#allocation15_spill]]  ;;  %p5001_p4 = scmp.eq.s32.totalorder (!%p4406_p10), %s4378_s21, 0 }
  0x2f   : > { %374 = sbr.rel (%p4406_p10) target bundleno = 1576 (0x628), region = 64 }
  0x33   : > { %3733 = dma.hbm_to_vmem [thread:$0]  (!%p4414_p12), %s5000_s5, 13824, %s333_s15, [#allocation8], %s4290_s22, %s4290_s22, %s4291_s24  }
  0x34   : > { %4261 = dma.done.wait (%p5001_p4), [#allocation5], 13824   ;;  %p5002_p13 = pmov %p5001_p4 }
  0x35   : > { %p5003_p7 = pmov %p5001_p4 }
  0x36   : > { %4263 = vsyncadd (%p5002_p13), [#allocation5], 4294953472 }
  0x37   : > { %4265 = dma.done.wait (%p5003_p7), [#allocation8], 13824   ;;  %p5004_p6 = pmov %p5001_p4 }
  0x38   : > { %v4292_v0 = vmov 0   ;;  %p420_p9 = scmp.lt.s32.totalorder %s4378_s21, 1  ;;  %v3370_v1 = vld [vmem:[%s4978_s1 + $0x88] sm:$0xff]  ;;  %vm521_vm0 = vcmask 1043456   ;;  %v439_v2 = vld [vmem:[%s4978_s1 + $0x40] sm:$0xff]  ;;  %v3405_v30 = vld [vmem:[%s4978_s1 + $0xd0] sm:$0xff] }
  0x39   : > { %4267 = vsyncadd (%p5004_p6), [#allocation8], 4294953472  ;;  %560 = vmatprep.mubr.bf16.mxu0 %v4292_v0  ;;  %656 = vmatprep.mubr.bf16.mxu1 %v4292_v0  ;;  %v3382_v3 = vcombine.high %v3370_v1, %v3370_v1  ;;  %v3394_v4 = vcombine.high %v439_v2, %v439_v2  ;;  %v3381_v5 = vcombine.low %v3370_v1, %v3370_v1  ;;  %v3787_v7 = vld [vmem:[%s4978_s1 + $0x7c] ss:$8 sps:$4 sm:$0xff]   ;;  %v3791_v11 = vld [vmem:[%s4978_s1 + $0x78] ss:$8 sps:$4 sm:$0xff]  }
  0x3a   : > { %s4456_s15 = scalar_select %p420_p9, %s4378_s21, 1  ;;  %v3393_v6 = vcombine.low %v439_v2, %v439_v2  ;;  %v3789_v8 = vld [vmem:[%s4978_s1 + $0x34] ss:$8 sps:$4 sm:$0xff]   ;;  %v3792_v12 = vld [vmem:[%s4978_s1 + $0x30] ss:$8 sps:$4 sm:$0xff]   ;;  %v3416_v35 = vcombine.high %v3405_v30, %v3405_v30  ;;  %v3415_v36 = vcombine.low %v3405_v30, %v3405_v30  ;;  %vm517_vm2 = vcmask 588800  }
  0x3b   : > { %3383 = vmatprep.subr.msk.bf16.mxu0 %vm521_vm0, %v3382_v3  ;;  %3395 = vmatprep.subr.msk.bf16.mxu1 %vm521_vm0, %v3394_v4  ;;  %v523_v9 = vsel %vm521_vm0, %v3381_v5, 0  ;;  %v3793_v13 = vld [vmem:[%s4978_s1 + $0x6c] ss:$8 sps:$4 sm:$0xff]   ;;  %v3797_v15 = vld [vmem:[%s4978_s1 + $0x68] ss:$8 sps:$4 sm:$0xff]   ;;  %vm4990_vm3 = vcmask 1046528  }
  0x3c   : > { %v619_v10 = vsel %vm521_vm0, %v3393_v6, 0  ;;  %535 = vmatpush1.bf16.msra.mxu0 %v523_v9  ;;  %s3716_s12 = smul.u32 12, %s4456_s15  ;;  %v3795_v14 = vld [vmem:[%s4978_s1 + $0x24] ss:$8 sps:$4 sm:$0xff]   ;;  %v3798_v16 = vld [vmem:[%s4978_s1 + $0x20] ss:$8 sps:$4 sm:$0xff]   ;;  %s427_s14 = scalar_lea.vmem %s4987_s10, %s4456_s15 }
  0x3d   : > { %631 = vmatpush1.bf16.msra.mxu1 %v619_v10  ;;  %536 = vmatprep.subr.bf16.mxu0 %v3787_v7  ;;  %v3799_v17 = vld [vmem:[%s4978_s1 + $0x5c] ss:$8 sps:$4 sm:$0xff]   ;;  %v3803_v19 = vld [vmem:[%s4978_s1 + $0x58] ss:$8 sps:$4 sm:$0xff]   ;;  %v3805_v21 = vld [vmem:[%s4978_s1 + $0x4c] ss:$8 sps:$4 sm:$0xff]  }
  0x3e   : > { %632 = vmatprep.subr.bf16.mxu1 %v3789_v8  ;;  %s4493_s5 = scalar_lea.vmem %s4977_s0, %s3716_s12  ;;  %v3801_v18 = vld [vmem:[%s4978_s1 + $0x14] ss:$8 sps:$4 sm:$0xff]   ;;  %v3804_v20 = vld [vmem:[%s4978_s1 + $0x10] ss:$8 sps:$4 sm:$0xff]   ;;  %v3807_v26 = vld [vmem:[%s4978_s1 + $0x4] ss:$8 sps:$4 sm:$0xff]  }
  0x3f   : > { %v429_v22 = vld [vmem:[%s4493_s5] sm:$0xf]  ;;  %v430_v23 = vld [vmem:[%s4493_s5 + $0x4] sm:$0xf]  ;;  %v3809_v31 = vld [vmem:[%s4978_s1 + $0x48] ss:$8 sps:$4 sm:$0xff]  }
  0x40   : > { %537 = vmatpush1.bf16.msra.mxu0 %v3791_v11  ;;  %v3371_v24 = vcombine.low %v429_v22, %v430_v23  ;;  %v3812_v25 = vld [vmem:[%s4493_s5 + $0x8] ss:$0 sps:$4 sm:$0x11]   ;;  %vm459_vm1 = vsmask.f32 7424  ;;  %v734_v40 = vsel %vm521_vm0, %v3415_v36, 0 }
  0x41   : > { %633 = vmatpush1.bf16.msra.mxu1 %v3792_v12  ;;  %538 = vmatprep.subr.bf16.mxu0 %v3793_v13  ;;  %v468_v29 = vshll.u32 %v3812_v25, 16  ;;  %v3810_v32 = vld [vmem:[%s4978_s1] ss:$8 sps:$4 sm:$0xff]   ;;  %v3817_v38 = vld [vmem:[%s4978_s1 + $0xc4] ss:$8 sps:$4 sm:$0xff]   ;;  %v683_v51 = vrot.slane %v3812_v25, 1 }
  0x42   : > { %634 = vmatprep.subr.bf16.mxu1 %v3795_v14  ;;  %v461_v27 = vshrl.u32 %v3371_v24, 16  ;;  %v463_v28 = vshll.u32 %v3371_v24, 16  ;;  %v3815_v41 = vld [vmem:[%s4978_s1 + $0xc0] ss:$8 sps:$4 sm:$0xff]   ;;  %v3820_v42 = vld [vmem:[%s4978_s1 + $0xb4] ss:$8 sps:$4 sm:$0xff]  }
  0x43   : > { %v470_v34 = vrot.slane %v468_v29, 1  ;;  %v3818_v43 = vld [vmem:[%s4978_s1 + $0xb0] ss:$8 sps:$4 sm:$0xff]   ;;  %v3823_v44 = vld [vmem:[%s4978_s1 + $0xa4] ss:$8 sps:$4 sm:$0xff]   ;;  %vm806_vm5 = vcmask 1040384  }
  0x44   : > { %539 = vmatpush1.bf16.msra.mxu0 %v3797_v15  ;;  %v465_v33 = vrot.slane %v463_v28, 1  ;;  %v667_v45 = vld [vmem:[%s4493_s5] sm:$0xe]  ;;  %v3826_v47 = vld [vmem:[%s4978_s1 + $0x94] ss:$8 sps:$4 sm:$0xff]   ;;  %vm809_vm6 = vcmask 1044484  }
  0x45   : > { %635 = vmatpush1.bf16.msra.mxu1 %v3798_v16  ;;  %540 = vmatprep.subr.bf16.mxu0 %v3799_v17  ;;  %v3821_v46 = vld [vmem:[%s4978_s1 + $0xa0] ss:$8 sps:$4 sm:$0xff]   ;;  %v3406_v48 = vcombine.low %v667_v45, %v430_v23  ;;  %v3824_v49 = vld [vmem:[%s4978_s1 + $0x90] ss:$8 sps:$4 sm:$0xff]   ;;  %v3830_v54 = vld [vmem:[#allocation4 + $0x194] ss:$8 sps:$4 sm:$0xff]  }
  0x46   : > { %636 = vmatprep.subr.bf16.mxu1 %v3801_v18  ;;  %v466_v37 = vor.u32 %v465_v33, %v461_v27  ;;  %v3828_v53 = vld [vmem:[#allocation4 + $0x190] ss:$8 sps:$4 sm:$0xff]   ;;  %v3833_v55 = vld [vmem:[#allocation4 + $0x184] ss:$8 sps:$4 sm:$0xff]   ;;  %v3831_v56 = vld [vmem:[#allocation4 + $0x180] ss:$8 sps:$4 sm:$0xff]   ;;  %v788_v33 = vlaneseq }
  0x47   : > { %v682_v50 = vrot.slane %v3406_v48, 1  ;;  %v3836_v57 = vld [vmem:[#allocation4 + $0x174] ss:$8 sps:$4 sm:$0xff]   ;;  %vm807_vm4 = vsmask.f32 256  ;;  %vm816_vm9 = vcmask 253952  }
  0x48   : > { %541 = vmatpush1.bf16.msra.mxu0 %v3803_v19  ;;  %v471_v39 = vsel %vm459_vm1, %v466_v37, %v470_v34  ;;  %v3834_v58 = vld [vmem:[#allocation4 + $0x170] ss:$8 sps:$4 sm:$0xff]   ;;  %vm4558_vm7 = vmand %vm806_vm5, %vm807_vm4  ;;  %vm810_vm8 = vsmask.f32 4352  ;;  %vm833_vm10 = vcmask 125952   ;;  %vm838_vm15 = vcmask 257152  }
  0x49   : > { %637 = vmatpush1.bf16.msra.mxu1 %v3804_v20  ;;  %542 = vmatprep.subr.bf16.mxu0 %v3805_v21  ;;  %v684_v52 = vsel %vm4990_vm3, %v682_v50, %v683_v51  ;;  %v813_v60 = vld [vmem:[#allocation2] sm:$0x11]  ;;  %v3839_v61 = vld [vmem:[#allocation4 + $0x164] ss:$8 sps:$4 sm:$0xff]   ;;  %vm4563_vm11 = vmand %vm809_vm6, %vm810_vm8  ;;  %vm821_vm12 = vsmask.f32 7938 }
  0x4a   : > { %638 = vmatprep.subr.bf16.mxu1 %v3807_v26  ;;  %v818_v63 = vld [vmem:[#allocation2 + $0x8] sm:$0x1]  ;;  %835 = vst.msk [vmem:[#allocation2 + $0xc] sm:$0xf] %vm833_vm10, %v4292_v0  ;;  %1962 = vst.msk [vmem:[#allocation3 + $0xc] sm:$0xf] %vm833_vm10, %v4292_v0 }
  0x4b   : > { %v3837_v1 = vld [vmem:[#allocation4 + $0x160] ss:$8 sps:$4 sm:$0xff]   ;;  %vm812_vm13 = vmor %vm4563_vm11, %vm4558_vm7  ;;  %vm823_vm14 = vsmask.f32 7954  ;;  %v3842_v2 = vld [vmem:[#allocation4 + $0x154] ss:$8 sps:$4 sm:$0xff]  }
  0x4c   : > { %543 = vmatpush1.bf16.msra.mxu0 %v3809_v31  ;;  %v814_v3 = vsel %vm812_vm13, 0, %v813_v60  ;;  %v826_v5 = vld [vmem:[#allocation2 + $0x18] sm:$0x11]  ;;  %v1949_v6 = vld [vmem:[#allocation3] sm:$0x11]  ;;  %vm824_vm7 = vmand %vm809_vm6, %vm823_vm14  ;;  %vm891_vm8 = vcmask 1043584  }
  0x4d   : > { %639 = vmatpush1.bf16.msra.mxu1 %v3810_v32  ;;  %3417 = vmatprep.subr.msk.bf16.mxu0 %vm521_vm0, %v3416_v35  ;;  %vm4577_vm0 = vmand %vm816_vm9, %vm807_vm4  ;;  %840 = vst.msk [vmem:[#allocation2 + $0x14] sm:$0xf] %vm838_vm15, %v4292_v0  ;;  %v1950_v9 = vsel %vm812_vm13, 0, %v1949_v6  ;;  %v1952_v10 = vld [vmem:[#allocation3 + $0x8] sm:$0x1]  ;;  %vm893_vm13 = vcmask 1047556  }
  0x4e   : > { %1242 = vmatprep.subr.bf16.mxu1 %v3830_v54  ;;  %1965 = vst.msk [vmem:[#allocation3 + $0x14] sm:$0xf] %vm838_vm15, %v4292_v0  ;;  %815 = vst [vmem:[#allocation2] sm:$0x11] %v814_v3  ;;  %v819_v7 = vsel %vm4577_vm0, 0, %v818_v63  ;;  %v1953_v13 = vsel %vm4577_vm0, 0, %v1952_v10 }
  0x4f   : > { %3384 = vmatmul.mubr.msk.bf16.vlgmr.msra.gmra.mxu0 %vm517_vm2, %v471_v39  ;;  %v1955_v11 = vld [vmem:[#allocation3 + $0x18] sm:$0x11]  ;;  %820 = vst [vmem:[#allocation2 + $0x8] sm:$0x1] %v819_v7  ;;  %834 = vst.msk [vmem:[#allocation2] sm:$0xf] %vm833_vm10, %v4292_v0 }
  0x50   : > { %3396 = vmatmul.mubr.msk.bf16.vlgmr.msra.gmra.mxu1 %vm517_vm2, %v3371_v24  ;;  %746 = vmatpush1.bf16.msra.mxu0 %v734_v40  ;;  %v830_v12 = vld [vmem:[#allocation2 + $0x20] sm:$0x1]  ;;  %1951 = vst [vmem:[#allocation3] sm:$0x11] %v1950_v9  ;;  %v1958_v14 = vld [vmem:[#allocation3 + $0x20] sm:$0x1]  ;;  %vm829_vm6 = vmand %vm816_vm9, %vm821_vm12 }
  0x51   : > { %771 = vmatprep.mubr.bf16.mxu0 %v4292_v0  ;;  %747 = vmatprep.subr.bf16.mxu0 %v3817_v38  ;;  %839 = vst.msk [vmem:[#allocation2 + $0x8] sm:$0xf] %vm838_vm15, %v4292_v0  ;;  %1954 = vst [vmem:[#allocation3 + $0x8] sm:$0x1] %v1953_v13  ;;  %v3840_v17 = vld [vmem:[#allocation4 + $0x150] ss:$8 sps:$4 sm:$0xff]  }
  0x52   : > { %1243 = vmatpush1.bf16.msra.mxu1 %v3828_v53  ;;  %1961 = vst.msk [vmem:[#allocation3] sm:$0xf] %vm833_vm10, %v4292_v0  ;;  %v831_v18 = vsel %vm829_vm6, 0, %v830_v12  ;;  %vm4611_vm0 = vmand %vm891_vm8, %vm821_vm12  ;;  %v1959_v20 = vsel %vm829_vm6, 0, %v1958_v14  ;;  %v3845_v21 = vld [vmem:[#allocation4 + $0x144] ss:$8 sps:$4 sm:$0xff]  }
  0x53   : > { %1244 = vmatprep.subr.bf16.mxu1 %v3833_v55  ;;  %1964 = vst.msk [vmem:[#allocation3 + $0x8] sm:$0xf] %vm838_vm15, %v4292_v0  ;;  %832 = vst [vmem:[#allocation2 + $0x20] sm:$0x1] %v831_v18  ;;  %v3843_v23 = vld [vmem:[#allocation4 + $0x140] ss:$8 sps:$4 sm:$0xff]  }
  0x54   : > { %748 = vmatpush1.bf16.msra.mxu0 %v3815_v41  ;;  %vm4617_vm9 = vmand %vm893_vm13, %vm823_vm14  ;;  %1960 = vst [vmem:[#allocation3 + $0x20] sm:$0x1] %v1959_v20  ;;  %v3848_v24 = vld [vmem:[#allocation4 + $0x134] ss:$8 sps:$4 sm:$0xff]   ;;  %v3846_v25 = vld [vmem:[#allocation4 + $0x130] ss:$8 sps:$4 sm:$0xff]  }
  0x55   : > { %749 = vmatprep.subr.bf16.mxu0 %v3820_v42  ;;  %vm4991_vm15 = vmor %vm4617_vm9, %vm4611_vm0  ;;  %v3851_v26 = vld [vmem:[#allocation4 + $0x124] ss:$8 sps:$4 sm:$0xff]   ;;  %v3849_v27 = vld [vmem:[#allocation4 + $0x120] ss:$8 sps:$4 sm:$0xff]   ;;  %v789_v36 = vshrl.u32 %v788_v33, 7  ;;  %vm841_vm14 = vcmask 254080  }
  0x56   : > { %1245 = vmatpush1.bf16.msra.mxu1 %v3831_v56  ;;  %v3854_v28 = vld [vmem:[#allocation4 + $0x214] ss:$8 sps:$4 sm:$0xff]   ;;  %v3852_v29 = vld [vmem:[#allocation4 + $0x210] ss:$8 sps:$4 sm:$0xff]   ;;  %v3857_v30 = vld [vmem:[#allocation4 + $0x204] ss:$8 sps:$4 sm:$0xff]  }
  0x57   : > { %1246 = vmatprep.subr.bf16.mxu1 %v3836_v57  ;;  %v3855_v31 = vld [vmem:[#allocation4 + $0x200] ss:$8 sps:$4 sm:$0xff]   ;;  %v4625_v39 = vsub.s32 0, %v789_v36  ;;  %v786_v40 = vld [vmem:[%s4979_s2] sm:$0x3]  ;;  %v4630_v41 = vsub.s32 1, %v789_v36 }
  0x58   : > { %750 = vmatpush1.bf16.msra.mxu0 %v3818_v43  ;;  %842 = vst.msk [vmem:[#allocation2 + $0x20] sm:$0x1] %vm841_vm14, %v4292_v0  ;;  %1966 = vst.msk [vmem:[#allocation3 + $0x20] sm:$0x1] %vm841_vm14, %v4292_v0  ;;  %v3860_v55 = vld [vmem:[#allocation4 + $0x1f4] ss:$8 sps:$4 sm:$0xff]  }
  0x59   : > { %751 = vmatprep.subr.bf16.mxu0 %v3823_v44  ;;  %v791_v45 = vrot.slane %v786_v40, %v4625_v39  ;;  %v3858_v57 = vld [vmem:[#allocation4 + $0x1f0] ss:$8 sps:$4 sm:$0xff]   ;;  %v3863_v4 = vld [vmem:[#allocation4 + $0x1e4] ss:$8 sps:$4 sm:$0xff]   ;;  %v3872_v18 = vld [vmem:[#allocation4 + $0x234] ss:$8 sps:$4 sm:$0xff]  }
  0x5a   : > { %1247 = vmatpush1.bf16.msra.mxu1 %v3834_v58  ;;  %v3864_v12 = vld [vmem:[#allocation4 + $0x1d0] ss:$8 sps:$4 sm:$0xff]   ;;  %v3869_v13 = vld [vmem:[#allocation4 + $0x1c4] ss:$8 sps:$4 sm:$0xff]   ;;  %v3867_v20 = vld [vmem:[#allocation4 + $0x1c0] ss:$8 sps:$4 sm:$0xff]  }
  0x5b   : > { %1248 = vmatprep.subr.bf16.mxu1 %v3839_v61  ;;  %s4293_s24 = smov 16   ;;  %vm909_vm6 = vcmask 1040512   ;;  %vm881_vm14 = vcmask 130048   ;;  %s418_s3 = sand.u32 1, %s4278_s18  }
  0x5c   : > { %752 = vmatpush1.bf16.msra.mxu0 %v3821_v46  ;;  %vm4678_vm3 = vmand %vm909_vm6, %vm807_vm4  ;;  %s3664_s12 = sshll.u32 %s4378_s21, 4  ;;  %s419_s29 = scalar_lea.vmem [#allocation9], %s418_s3 }
  0x5d   : > { %753 = vmatprep.subr.bf16.mxu0 %v3826_v47  ;;  %vm911_vm6 = vmor %vm4563_vm11, %vm4678_vm3  ;;  %vm4295_vm11 = vmmov 0   ;;  %s3267_s13 = sshll.u32 %s419_s29, 4  ;;  %s4942_s22 = scalar_lea.hbm %s4988_s11, %s3664_s12  ;;  %s3268_s13 = int_to_ptr.vmem [resolvable:$true] %s3267_s13 }
  0x5e   : > { %1249 = vmatpush1.bf16.msra.mxu1 %v3837_v1  ;;  %s4218_s25 = scalar_lea.vmem %s3268_s13, 16  ;;  %s4296_s30 = smov [#allocation9]  }
  0x5f   : > { %1250 = vmatprep.subr.bf16.mxu1 %v3842_v2  ;;  %p4219_p10 = scmp.ne.s32.totalorder %s3268_s13, %s4218_s25  ;;  %s4222_s21 = sshll.u32 %s4296_s30, 4  ;;  %s4223_s21 = int_to_ptr.vmem [resolvable:$false] %s4222_s21 }
  0x60   : > { %754 = vmatpush1.bf16.msra.mxu0 %v3824_v49  ;;  %v795_v49 = vrot.slane %v786_v40, %v4630_v41  ;;  %p4225_p11 = scmp.lt.s32.totalorder %s3268_s13, %s4223_s21 }
  0x61   : > { %1297 = vmatprep.subr.bf16.mxu0 %v3872_v18  ;;  %p4220_p12 = pnand %p4219_p10, %p4395_p5 }
  0x62   : > { %1251 = vmatpush1.bf16.msra.mxu1 %v3840_v17  ;;  %v3870_v17 = vld [vmem:[#allocation4 + $0x230] ss:$8 sps:$4 sm:$0xff]  }
  0x63   : > { %3418 = vmatmul.mubr.msk.bf16.vlgmr.msra.gmra.mxu0 %vm517_vm2, %v684_v52  ;;  %vm4589_vm2 = vmand %vm806_vm5, %vm821_vm12  ;;  %1252 = vmatprep.subr.bf16.mxu1 %v3845_v21  ;;  %p4221_p8 = pneg %p4220_p12 }
  0x64   : > { %1317 = vmatprep.mubr.bf16.mxu0 %v4292_v0  ;;  %vm825_vm5 = vmor %vm824_vm7, %vm4589_vm2  ;;  %vm836_vm2 = vcmask 122880   ;;  %vm853_vm7 = vsmask.f32 4368  ;;  %1298 = vmatpush1.bf16.msra.mxu0 %v3870_v17 }
  0x65   : > { %v827_v15 = vsel %vm825_vm5, 0, %v826_v5  ;;  %v1956_v16 = vsel %vm825_vm5, 0, %v1955_v11  ;;  %v3861_v5 = vld [vmem:[#allocation4 + $0x1e0] ss:$8 sps:$4 sm:$0xff]   ;;  %v3866_v11 = vld [vmem:[#allocation4 + $0x1d4] ss:$8 sps:$4 sm:$0xff]   ;;  %vm4663_vm5 = vmor %vm807_vm4, %vm853_vm7 }
  0x66   : > { %828 = vst [vmem:[#allocation2 + $0x18] sm:$0x11] %v827_v15  ;;  %1957 = vst [vmem:[#allocation3 + $0x18] sm:$0x11] %v1956_v16  ;;  %1253 = vmatpush1.bf16.msra.mxu1 %v3843_v23 }
  0x67   : > { %1254 = vmatprep.subr.bf16.mxu1 %v3848_v24  ;;  %837 = vst.msk [vmem:[#allocation2 + $0x18] sm:$0x1] %vm836_vm2, %v4292_v0  ;;  %1963 = vst.msk [vmem:[#allocation3 + $0x18] sm:$0x1] %vm836_vm2, %v4292_v0  ;;  %v3875_v24 = vld [vmem:[#allocation4 + $0x1b4] ss:$8 sps:$4 sm:$0xff]  }
  0x68   : > { %vm4673_vm7 = vmand %vm833_vm10, %vm821_vm12 }
  0x69   : > { %vm4692_vm12 = vmand %vm836_vm2, %vm807_vm4  ;;  %vm1238_vm4 = vcmask 261120  }
  0x6a   : > { %1255 = vmatpush1.bf16.msra.mxu1 %v3846_v25  ;;  %v3878_v25 = vld [vmem:[#allocation4 + $0x224] ss:$8 sps:$4 sm:$0xff]  }
  0x6b   : > { %1256 = vmatprep.subr.bf16.mxu1 %v3851_v26  ;;  %v3876_v26 = vld [vmem:[#allocation4 + $0x220] ss:$8 sps:$4 sm:$0xff]   ;;  %1299 = vmatprep.subr.bf16.mxu0 %v3878_v25 }
  0x6c   : > { %1300 = vmatpush1.bf16.msra.mxu0 %v3876_v26 }
  0x6e   : > { %1257 = vmatpush1.bf16.msra.mxu1 %v3849_v27 }
  0x6f   : > { %1258 = vmatprep.subr.bf16.mxu1 %v3854_v28 }
  0x72   : > { %1259 = vmatpush2.bf16.msra.mxu1 %v3852_v29  ;;  %v3884_v29 = vld [vmem:[#allocation4 + $0x74] ss:$8 sps:$4 sm:$0xff]  }
  0x73   : > { %1260 = vmatprep.subr.bf16.mxu1 %v3857_v30  ;;  %1512 = vmatprep.subr.bf16.mxu0 %v3884_v29 }
  0x76   : > { %1261 = vmatpush2.bf16.msra.mxu1 %v3855_v31  ;;  %v3873_v31 = vld [vmem:[#allocation4 + $0x1b0] ss:$8 sps:$4 sm:$0xff]  }
  0x77   : > { %1262 = vmatprep.subr.bf16.mxu1 %v3860_v55 }
  0x7a   : > { %1263 = vmatpush2.bf16.msra.mxu1 %v3858_v57 }
  0x7b   : > { %1264 = vmatprep.subr.bf16.mxu1 %v3863_v4 }
  0x7e   : > { %1265 = vmatpush2.bf16.msra.mxu1 %v3861_v5 }
  0x7f   : > { %1266 = vmatprep.subr.bf16.mxu1 %v3866_v11 }
  0x82   : > { %1267 = vmatpush2.bf16.msra.mxu1 %v3864_v12 }
  0x83   : > { %1268 = vmatprep.subr.bf16.mxu1 %v3869_v13 }
  0x86   : > { %1269 = vmatpush2.bf16.msra.mxu1 %v3867_v20 }
  0x87   : > { %1270 = vmatprep.subr.bf16.mxu1 %v3875_v24 }
  0x8a   : > { %1271 = vmatpush2.bf16.msra.mxu1 %v3873_v31  ;;  %v3882_v31 = vld [vmem:[#allocation4 + $0x70] ss:$8 sps:$4 sm:$0xff]  }
 0x10f   : > { %v562_v32 = vpop.f32.mrf.mxu0 }
 0x110   : > { %v658_v34 = vpop.f32.mrf.mxu1 }
 0x111   : > { %v564_v35 = vpop.f32.mrf.mxu0  ;;  %v659_v44 = vadd.f32 %v658_v34, %v562_v32 }
 0x112   : > { %v660_v37 = vpop.f32.mrf.mxu1 }
 0x113   : > { %v566_v38 = vpop.f32.mrf.mxu0  ;;  %v661_v47 = vadd.f32 %v660_v37, %v564_v35  ;;  %v3881_v35 = vld [vmem:[#allocation4 + $0x1a4] ss:$8 sps:$4 sm:$0xff]   ;;  %v3879_v37 = vld [vmem:[#allocation4 + $0x1a0] ss:$8 sps:$4 sm:$0xff]  }
 0x114   : > { %v662_v42 = vpop.f32.mrf.mxu1  ;;  %1272 = vmatprep.subr.bf16.mxu1 %v3881_v35 }
 0x115   : > { %v568_v43 = vpop.f32.mrf.mxu0  ;;  %v663_v52 = vadd.f32 %v662_v42, %v566_v38  ;;  %1273 = vmatpush2.bf16.msra.mxu1 %v3879_v37  ;;  %v3890_v38 = vld [vmem:[#allocation4 + $0x114] ss:$8 sps:$4 sm:$0xff]   ;;  %v901_v42 = vld [vmem:[#allocation2 + $0x8] sm:$0xf] }
 0x116   : > { %v664_v50 = vpop.f32.mrf.mxu1  ;;  %1567 = vmatprep.subr.bf16.mxu1 %v3890_v38 }
 0x117   : > { %v665_v58 = vadd.f32 %v664_v50, %v568_v43 }
 0x123   : > { %v773_v46 = vpop.f32.mrf.mxu0 }
 0x124   : > { %v782_v48 = vadd.f32 %v773_v46, %v659_v44  ;;  %v896_v44 = vld [vmem:[#allocation2] sm:$0xff] }
 0x125   : > { %v775_v51 = vpop.f32.mrf.mxu0 }
 0x126   : > { %v4636_v53 = vadd.f32 %v791_v45, %v782_v48  ;;  %v783_v54 = vadd.f32 %v775_v51, %v661_v47  ;;  %v917_v51 = vld [vmem:[#allocation2 + $0x20] sm:$0x1] }
 0x127   : > { %v777_v56 = vpop.f32.mrf.mxu0 }
 0x128   : > { %v4642_v59 = vadd.f32 %v795_v49, %v783_v54  ;;  %v784_v60 = vadd.f32 %v777_v56, %v663_v52  ;;  %v802_v63 = vmax.f32 %v4636_v53, 0.0  ;;  %v912_v54 = vld [vmem:[#allocation2 + $0x18] sm:$0x11] }
 0x129   : > { %v779_v61 = vpop.f32.mrf.mxu0 }
 0x12a   : > { %v803_v1 = vmax.f32 %v4642_v59, 0.0  ;;  %v4646_v2 = vadd.f32 %v791_v45, %v784_v60  ;;  %v785_v3 = vadd.f32 %v779_v61, %v665_v58 }
 0x12c   : > { %v3667_v6 = vpack.c.bf16 %v803_v1, %v802_v63  ;;  %v4652_v7 = vadd.f32 %v795_v49, %v785_v3  ;;  %v804_v8 = vmax.f32 %v4646_v2, 0.0 }
 0x12e   : > { %v805_v9 = vmax.f32 %v4652_v7, 0.0  ;;  %v856_v10 = vshrl.u32 %v3667_v6, 16  ;;  %v859_v16 = vshll.u32 %v3667_v6, 16  ;;  %v3176_v7 = vld [vmem:[%s4985_s8] sm:$0xff] }
 0x130   : > { %v3668_v14 = vpack.c.bf16 %v805_v9, %v804_v8  ;;  %v858_v15 = vrot.slane %v856_v10, 7 }
 0x132   : > { %v861_v21 = vor.u32 %v859_v16, %v858_v15  ;;  %v864_v23 = vshrl.u32 %v3668_v14, 16  ;;  %v867_v27 = vshll.u32 %v3668_v14, 16  ;;  %v862_v32 = vrot.slane %v858_v15, 4 }
 0x134   : > { %872 = vrot.lane.b32.xlu0 %v861_v21, %s4293_s24  ;;  %v866_v28 = vrot.slane %v864_v23, 7 }
 0x136   : > { %v871_v33 = vrot.slane %v866_v28, 4  ;;  %v869_v34 = vor.u32 %v867_v27, %v866_v28 }
 0x138   : > { %876 = vrot.lane.b32.xlu1 %v871_v33, %s4293_s24  ;;  %v870_v36 = vsel %vm4663_vm5, %v862_v32, %v869_v34 }
 0x139   : > { %874 = vrot.lane.b32.xlu0 %v870_v36, %s4293_s24 }
 0x1a6   : > { %v873_v43 = vpop.permute.xlu0 %872 }
 0x1a7   : > { %v878_v45 = vrot.slane %v873_v43, 4 }
 0x1a9   : > { %v882_v47 = vsel %vm881_vm14, %v878_v45, %v873_v43  ;;  %v902_v48 = vsel %vm4673_vm7, %v878_v45, %v901_v42 }
 0x1aa   : > { %v897_v49 = vsel %vm4991_vm15, %v882_v47, %v896_v44  ;;  %903 = vst [vmem:[#allocation2 + $0x8] sm:$0xf] %v902_v48  ;;  %v877_v52 = vpop.permute.xlu1 %876  ;;  %vm4702_vm15 = vmor %vm893_vm13, %vm891_vm8  ;;  %vm5027_vm8 = vcmask 1046528  }
 0x1ab   : > { %898 = vst [vmem:[#allocation2] sm:$0xff] %v897_v49  ;;  %v880_v55 = vrot.slane %v877_v52, 4  ;;  %v875_v56 = vpop.permute.xlu0 %874  ;;  %vm5028_vm13 = vmmov %vm5027_vm8 }
 0x1ac   : > { %v879_v58 = vrot.slane %v875_v56, 4  ;;  %vm5029_vm2 = vmmov %vm5027_vm8 }
 0x1ad   : > { %v884_v60 = vsel %vm881_vm14, %v880_v55, %v877_v52  ;;  %v918_v61 = vsel %vm4692_vm12, %v880_v55, %v917_v51  ;;  %vm5031_vm3 = vmmov %vm5029_vm2 }
 0x1ae   : > { %v913_v3 = vsel %vm911_vm6, %v884_v60, %v912_v54  ;;  %919 = vst [vmem:[#allocation2 + $0x20] sm:$0x1] %v918_v61  ;;  %v883_v4 = vsel %vm881_vm14, %v879_v58, %v875_v56  ;;  %908 = vst.msk [vmem:[#allocation2 + $0x14] sm:$0xf] %vm833_vm10, %v879_v58  ;;  %v3894_v54 = vld [vmem:[#allocation4 + $0x64] ss:$8 sps:$4 sm:$0xff]  }
 0x1af   : > { %914 = vst [vmem:[#allocation2 + $0x18] sm:$0x11] %v913_v3  ;;  %907 = vst.msk [vmem:[#allocation2 + $0xc] sm:$0xff] %vm4702_vm15, %v883_v4  ;;  %v3897_v58 = vld [vmem:[#allocation4 + $0x104] ss:$8 sps:$4 sm:$0xff]  }
 0x1b0   : > { %v3892_v4 = vld [vmem:[#allocation4 + $0x60] ss:$8 sps:$4 sm:$0xff]  }
 0x1b1   : > { %v921_v5 = vld [vmem:[#allocation2 + $0x8] sm:$0xf] }
 0x1b2   : > { %v1599_v18 = vld [vmem:[#allocation2 + $0x8] sm:$0xe]  ;;  %v1598_v38 = vld [vmem:[#allocation2] sm:$0xee] }
 0x1b5   : > { %v923_v6 = vld [vmem:[#allocation2 + $0x14] sm:$0xf]  ;;  %v3886_v11 = vld [vmem:[#allocation2 + $0x20] ss:$0 sps:$4 sm:$0x11]  }
 0x1b6   : > { %v4718_v10 = vcombine.low %v921_v5, %v923_v6  ;;  %v922_v12 = vld [vmem:[#allocation2 + $0xc] sm:$0xff]  ;;  %v960_v13 = vld [vmem:[#allocation2 + $0x18] sm:$0x11]  ;;  %v1052_v21 = vshll.u32 %v3886_v11, 16  ;;  %v3503_v23 = vcombine.low %v1599_v18, %v923_v6  ;;  %v1652_v45 = vrot.slane %v3886_v11, 1 }
 0x1b7   : > { %v3422_v14 = vcombine.high %v897_v49, %v922_v12  ;;  %v4720_v15 = vcombine.high %v960_v13, %v960_v13  ;;  %v4722_v16 = vcombine.low %v897_v49, %v922_v12  ;;  %v3424_v17 = vcombine.low %v960_v13, %v960_v13  ;;  %v3888_v49 = vld [vmem:[#allocation4 + $0x110] ss:$8 sps:$4 sm:$0xff]   ;;  %v3900_v5 = vld [vmem:[#allocation4 + $0x54] ss:$8 sps:$4 sm:$0xff]   ;;  %v3895_v13 = vld [vmem:[#allocation4 + $0x100] ss:$8 sps:$4 sm:$0xff]  }
 0x1b8   : > { %v1047_v20 = vshll.u32 %v4718_v10, 16  ;;  %v1045_v26 = vshrl.u32 %v4718_v10, 16  ;;  %v1054_v36 = vrot.slane %v1052_v21, 1  ;;  %v1651_v42 = vrot.slane %v3503_v23, 1  ;;  %v3898_v18 = vld [vmem:[#allocation4 + $0x50] ss:$8 sps:$4 sm:$0xff]  }
 0x1b9   : > { %v1035_v24 = vshll.u32 %v3422_v14, 16  ;;  %v1040_v25 = vshll.u32 %v4720_v15, 16  ;;  %v1023_v28 = vshll.u32 %v4722_v16, 16  ;;  %v1028_v29 = vshll.u32 %v3424_v17, 16  ;;  %v3901_v23 = vld [vmem:[#allocation4 + $0x2b0] ss:$8 sps:$4 sm:$0xff]  }
 0x1ba   : > { %v1049_v27 = vrot.slane %v1047_v20, 1  ;;  %v1033_v32 = vshrl.u32 %v3422_v14, 16  ;;  %v1021_v34 = vshrl.u32 %v4722_v16, 16  ;;  %v3501_v47 = vcombine.low %v1598_v38, %v922_v12  ;;  %v3906_v20 = vld [vmem:[#allocation4 + $0x44] ss:$8 sps:$4 sm:$0xff]  }
 0x1bb   : > { %v1037_v33 = vrot.slane %v1035_v24, 1  ;;  %v1025_v37 = vrot.slane %v1023_v28, 1  ;;  %v1042_v44 = vrot.slane %v1040_v25, 1  ;;  %v1030_v52 = vrot.slane %v1028_v29, 1  ;;  %v3904_v24 = vld [vmem:[#allocation4 + $0x40] ss:$8 sps:$4 sm:$0xff]  }
 0x1bc   : > { %v1050_v35 = vor.u32 %v1049_v27, %v1045_v26  ;;  %v1646_v55 = vrot.slane %v3424_v17, 1  ;;  %v4733_v60 = vsel %vm5027_vm8, %v1651_v42, %v1652_v45  ;;  %v1645_v61 = vrot.slane %v3501_v47, 1  ;;  %v3903_v17 = vld [vmem:[#allocation4 + $0x2b4] ss:$8 sps:$4 sm:$0xff]   ;;  %v3908_v27 = vld [vmem:[#allocation4 + $0x2a0] ss:$8 sps:$4 sm:$0xff]  }
 0x1bd   : > { %v1038_v43 = vor.u32 %v1037_v33, %v1033_v32  ;;  %v1026_v51 = vor.u32 %v1025_v37, %v1021_v34  ;;  %v3502_v6 = vcombine.high %v1598_v38, %v922_v12  ;;  %v3910_v12 = vld [vmem:[#allocation4 + $0x2a4] ss:$8 sps:$4 sm:$0xff]   ;;  %v3913_v26 = vld [vmem:[#allocation4 + $0x34] ss:$8 sps:$4 sm:$0xff]   ;;  %v3917_v33 = vld [vmem:[#allocation4 + $0x20] ss:$8 sps:$4 sm:$0xff]  }
 0x1be   : > { %v1055_v48 = vsel %vm459_vm1, %v1050_v35, %v1054_v36  ;;  %v4737_v11 = vsel %vm5028_vm13, %v1645_v61, %v1646_v55  ;;  %v3916_v28 = vld [vmem:[#allocation4 + $0x294] ss:$8 sps:$4 sm:$0xff]   ;;  %v3919_v29 = vld [vmem:[#allocation4 + $0x24] ss:$8 sps:$4 sm:$0xff]   ;;  %v3920_v34 = vld [vmem:[#allocation4 + $0x280] ss:$8 sps:$4 sm:$0xff]  }
 0x1bf   : > { %3463 = vmatmul.mubr.msk.bf16.vlgmr.msra.gmra.mxu0 %vm1238_vm4, %v1055_v48  ;;  %v1043_v56 = vsel %vm459_vm1, %v1038_v43, %v1042_v44  ;;  %v1031_v3 = vsel %vm459_vm1, %v1026_v51, %v1030_v52  ;;  %v1648_v21 = vrot.slane %v3502_v6, 1  ;;  %v3922_v32 = vld [vmem:[#allocation4 + $0x284] ss:$8 sps:$4 sm:$0xff]   ;;  %v3928_v35 = vld [vmem:[#allocation4 + $0x274] ss:$8 sps:$4 sm:$0xff]  }
 0x1c0   : > { %1513 = vmatpush1.bf16.msra.mxu0 %v3882_v31  ;;  %1274 = vmatprep.mubr.bf16.mxu1 %v1043_v56  ;;  %v3914_v31 = vld [vmem:[#allocation4 + $0x290] ss:$8 sps:$4 sm:$0xff]   ;;  %v3931_v37 = vld [vmem:[#allocation4 + $0x4] ss:$8 sps:$4 sm:$0xff]   ;;  %v3929_v43 = vld [vmem:[#allocation4] ss:$8 sps:$4 sm:$0xff]  }
 0x1c1   : > { %1544 = vmatprep.mubr.bf16.mxu0 %v3422_v14  ;;  %1275 = vmatmul.mubr.bf16.vlgmr.msra.gmra.mxu1 %v1031_v3  ;;  %v1649_v14 = vrot.slane %v4720_v15, 1  ;;  %v3911_v15 = vld [vmem:[#allocation4 + $0x30] ss:$8 sps:$4 sm:$0xff]   ;;  %v3934_v42 = vld [vmem:[#allocation4 + $0x264] ss:$8 sps:$4 sm:$0xff]  }
 0x1c2   : > { %1568 = vmatpush1.bf16.msra.mxu1 %v3888_v49  ;;  %1514 = vmatprep.subr.bf16.mxu0 %v3894_v54  ;;  %v3923_v36 = vld [vmem:[#allocation4 + $0x10] ss:$8 sps:$4 sm:$0xff]   ;;  %v3937_v44 = vld [vmem:[#allocation4 + $0xf4] ss:$8 sps:$4 sm:$0xff]   ;;  %v3932_v45 = vld [vmem:[#allocation4 + $0x260] ss:$8 sps:$4 sm:$0xff]  }
 0x1c3   : > { %1569 = vmatprep.subr.bf16.mxu1 %v3897_v58  ;;  %1587 = vmatprep.mubr.bf16.mxu1 %v4292_v0  ;;  %v1650_v25 = vsel %vm5029_vm2, %v1648_v21, %v1649_v14  ;;  %v3926_v38 = vld [vmem:[#allocation4 + $0x270] ss:$8 sps:$4 sm:$0xff]   ;;  %v3940_v47 = vld [vmem:[#allocation4 + $0x254] ss:$8 sps:$4 sm:$0xff]   ;;  %v3943_v49 = vld [vmem:[#allocation4 + $0xe4] ss:$8 sps:$4 sm:$0xff]  }
 0x1c4   : > { %1515 = vmatpush1.bf16.msra.mxu0 %v3892_v4  ;;  %v3935_v48 = vld [vmem:[#allocation4 + $0xf0] ss:$8 sps:$4 sm:$0xff]   ;;  %v3946_v52 = vld [vmem:[#allocation4 + $0x244] ss:$8 sps:$4 sm:$0xff]   ;;  %v3941_v54 = vld [vmem:[#allocation4 + $0xe0] ss:$8 sps:$4 sm:$0xff]  }
 0x1c5   : > { %1516 = vmatprep.subr.bf16.mxu0 %v3900_v5  ;;  %v3938_v51 = vld [vmem:[#allocation4 + $0x250] ss:$8 sps:$4 sm:$0xff]   ;;  %v3949_v55 = vld [vmem:[#allocation4 + $0xd4] ss:$8 sps:$4 sm:$0xff]   ;;  %v3944_v56 = vld [vmem:[#allocation4 + $0x240] ss:$8 sps:$4 sm:$0xff]  }
 0x1c6   : > { %1570 = vmatpush1.bf16.msra.mxu1 %v3895_v13  ;;  %v3952_v58 = vld [vmem:[#allocation4 + $0x334] ss:$8 sps:$4 sm:$0xff]   ;;  %v3947_v61 = vld [vmem:[#allocation4 + $0xd0] ss:$8 sps:$4 sm:$0xff]   ;;  %v3955_v3 = vld [vmem:[#allocation4 + $0xc4] ss:$8 sps:$4 sm:$0xff]  }
 0x1c7   : > { %1839 = vmatprep.subr.bf16.mxu1 %v3903_v17  ;;  %v3950_v4 = vld [vmem:[#allocation4 + $0x330] ss:$8 sps:$4 sm:$0xff]   ;;  %v3958_v5 = vld [vmem:[#allocation4 + $0x324] ss:$8 sps:$4 sm:$0xff]   ;;  %v3953_v6 = vld [vmem:[#allocation4 + $0xc0] ss:$8 sps:$4 sm:$0xff]  }
 0x1c8   : > { %1517 = vmatpush1.bf16.msra.mxu0 %v3898_v18  ;;  %v3961_v13 = vld [vmem:[#allocation4 + $0xb4] ss:$8 sps:$4 sm:$0xff]   ;;  %v3956_v17 = vld [vmem:[#allocation4 + $0x320] ss:$8 sps:$4 sm:$0xff]   ;;  %v3967_v21 = vld [vmem:[#allocation4 + $0xa4] ss:$8 sps:$4 sm:$0xff]  }
 0x1c9   : > { %3500 = vmatmul.mubr.msk.bf16.vlgmr.msra.gmra.mxu1 %vm1238_vm4, %v4718_v10  ;;  %1518 = vmatprep.subr.bf16.mxu0 %v3906_v20  ;;  %v3925_v10 = vld [vmem:[#allocation4 + $0x14] ss:$8 sps:$4 sm:$0xff]   ;;  %v3959_v20 = vld [vmem:[#allocation4 + $0xb0] ss:$8 sps:$4 sm:$0xff]  }
 0x1ca   : > { %1840 = vmatpush1.bf16.msra.mxu1 %v3901_v23  ;;  %1871 = vmatprep.mubr.bf16.mxu1 %v1650_v25  ;;  %v3964_v18 = vld [vmem:[#allocation4 + $0x314] ss:$8 sps:$4 sm:$0xff]   ;;  %v3962_v14 = vld [vmem:[#allocation4 + $0x310] ss:$8 sps:$4 sm:$0xff]   ;;  %v3970_v23 = vld [vmem:[#allocation4 + $0x304] ss:$8 sps:$4 sm:$0xff]  }
 0x1cb   : > { %1841 = vmatprep.subr.bf16.mxu1 %v3910_v12  ;;  %v3965_v12 = vld [vmem:[#allocation4 + $0xa0] ss:$8 sps:$4 sm:$0xff]  }
 0x1cc   : > { %1519 = vmatpush1.bf16.msra.mxu0 %v3904_v24  ;;  %v3973_v24 = vld [vmem:[#allocation4 + $0x94] ss:$8 sps:$4 sm:$0xff]   ;;  %v3968_v25 = vld [vmem:[#allocation4 + $0x300] ss:$8 sps:$4 sm:$0xff]  }
 0x1cd   : > { %1520 = vmatprep.subr.bf16.mxu0 %v3913_v26  ;;  %v3976_v26 = vld [vmem:[#allocation4 + $0x2f4] ss:$8 sps:$4 sm:$0xff]  }
 0x1ce   : > { %1842 = vmatpush1.bf16.msra.mxu1 %v3908_v27  ;;  %v3971_v27 = vld [vmem:[#allocation4 + $0x90] ss:$8 sps:$4 sm:$0xff]  }
 0x1cf   : > { %1843 = vmatprep.subr.bf16.mxu1 %v3916_v28  ;;  %v3979_v28 = vld [vmem:[#allocation4 + $0x84] ss:$8 sps:$4 sm:$0xff]  }
 0x1d0   : > { %1521 = vmatpush1.bf16.msra.mxu0 %v3911_v15  ;;  %v3974_v15 = vld [vmem:[#allocation4 + $0x2f0] ss:$8 sps:$4 sm:$0xff]  }
 0x1d1   : > { %1522 = vmatprep.subr.bf16.mxu0 %v3919_v29  ;;  %v3982_v29 = vld [vmem:[#allocation4 + $0x2e4] ss:$8 sps:$4 sm:$0xff]  }
 0x1d2   : > { %1844 = vmatpush1.bf16.msra.mxu1 %v3914_v31  ;;  %v3977_v31 = vld [vmem:[#allocation4 + $0x80] ss:$8 sps:$4 sm:$0xff]  }
 0x1d3   : > { %1845 = vmatprep.subr.bf16.mxu1 %v3922_v32  ;;  %v3985_v32 = vld [vmem:[#allocation4 + $0x354] ss:$8 sps:$4 sm:$0xff]  }
 0x1d4   : > { %1523 = vmatpush1.bf16.msra.mxu0 %v3917_v33  ;;  %v3980_v33 = vld [vmem:[#allocation4 + $0x2e0] ss:$8 sps:$4 sm:$0xff]  }
 0x1d5   : > { %1524 = vmatprep.subr.bf16.mxu0 %v3925_v10  ;;  %v3988_v10 = vld [vmem:[#allocation4 + $0x2d4] ss:$8 sps:$4 sm:$0xff]  }
 0x1d6   : > { %1846 = vmatpush1.bf16.msra.mxu1 %v3920_v34  ;;  %v3983_v34 = vld [vmem:[#allocation4 + $0x350] ss:$8 sps:$4 sm:$0xff]  }
 0x1d7   : > { %1847 = vmatprep.subr.bf16.mxu1 %v3928_v35  ;;  %v3991_v35 = vld [vmem:[#allocation4 + $0x344] ss:$8 sps:$4 sm:$0xff]  }
 0x1d8   : > { %1525 = vmatpush1.bf16.msra.mxu0 %v3923_v36  ;;  %v3986_v36 = vld [vmem:[#allocation4 + $0x2d0] ss:$8 sps:$4 sm:$0xff]  }
 0x1d9   : > { %1526 = vmatprep.subr.bf16.mxu0 %v3931_v37  ;;  %v3994_v37 = vld [vmem:[#allocation4 + $0x2c4] ss:$8 sps:$4 sm:$0xff]  }
 0x1da   : > { %1848 = vmatpush1.bf16.msra.mxu1 %v3926_v38  ;;  %v3989_v38 = vld [vmem:[#allocation4 + $0x340] ss:$8 sps:$4 sm:$0xff]  }
 0x1db   : > { %1849 = vmatprep.subr.bf16.mxu1 %v3934_v42  ;;  %v3992_v42 = vld [vmem:[#allocation4 + $0x2c0] ss:$8 sps:$4 sm:$0xff]  }
 0x1dc   : > { %1527 = vmatpush1.bf16.msra.mxu0 %v3929_v43  ;;  %v3999_v43 = vld [vmem:[#allocation7 + $0x194] ss:$8 sps:$4 sm:$0xff]  }
 0x1dd   : > { %1528 = vmatprep.subr.bf16.mxu0 %v3937_v44  ;;  %v4002_v44 = vld [vmem:[#allocation7 + $0x184] ss:$8 sps:$4 sm:$0xff]  }
 0x1de   : > { %1850 = vmatpush1.bf16.msra.mxu1 %v3932_v45  ;;  %v4000_v45 = vld [vmem:[#allocation7 + $0x180] ss:$8 sps:$4 sm:$0xff]  }
 0x1df   : > { %1851 = vmatprep.subr.bf16.mxu1 %v3940_v47  ;;  %v4005_v47 = vld [vmem:[#allocation7 + $0x174] ss:$8 sps:$4 sm:$0xff]  }
 0x1e0   : > { %1529 = vmatpush2.bf16.msra.mxu0 %v3935_v48  ;;  %v4003_v48 = vld [vmem:[#allocation7 + $0x170] ss:$8 sps:$4 sm:$0xff]  }
 0x1e1   : > { %1530 = vmatprep.subr.bf16.mxu0 %v3943_v49  ;;  %v4008_v49 = vld [vmem:[#allocation7 + $0x164] ss:$8 sps:$4 sm:$0xff]  }
 0x1e2   : > { %1852 = vmatpush1.bf16.msra.mxu1 %v3938_v51  ;;  %v4006_v51 = vld [vmem:[#allocation7 + $0x160] ss:$8 sps:$4 sm:$0xff]  }
 0x1e3   : > { %1853 = vmatprep.subr.bf16.mxu1 %v3946_v52  ;;  %v4014_v52 = vld [vmem:[#allocation7 + $0x144] ss:$8 sps:$4 sm:$0xff]  }
 0x1e4   : > { %1531 = vmatpush2.bf16.msra.mxu0 %v3941_v54  ;;  %v4012_v54 = vld [vmem:[#allocation7 + $0x140] ss:$8 sps:$4 sm:$0xff]  }
 0x1e5   : > { %1532 = vmatprep.subr.bf16.mxu0 %v3949_v55  ;;  %v4017_v55 = vld [vmem:[#allocation7 + $0x134] ss:$8 sps:$4 sm:$0xff]  }
 0x1e6   : > { %1854 = vmatpush1.bf16.msra.mxu1 %v3944_v56  ;;  %v4015_v56 = vld [vmem:[#allocation7 + $0x130] ss:$8 sps:$4 sm:$0xff]  }
 0x1e7   : > { %1855 = vmatprep.subr.bf16.mxu1 %v3952_v58  ;;  %v4020_v58 = vld [vmem:[#allocation7 + $0x124] ss:$8 sps:$4 sm:$0xff]  }
 0x1e8   : > { %1533 = vmatpush2.bf16.msra.mxu0 %v3947_v61  ;;  %v4018_v61 = vld [vmem:[#allocation7 + $0x120] ss:$8 sps:$4 sm:$0xff]  }
 0x1e9   : > { %1534 = vmatprep.subr.bf16.mxu0 %v3955_v3  ;;  %v4023_v3 = vld [vmem:[#allocation7 + $0x214] ss:$8 sps:$4 sm:$0xff]  }
 0x1ea   : > { %1856 = vmatpush2.bf16.msra.mxu1 %v3950_v4  ;;  %v4021_v4 = vld [vmem:[#allocation7 + $0x210] ss:$8 sps:$4 sm:$0xff]  }
 0x1eb   : > { %1857 = vmatprep.subr.bf16.mxu1 %v3958_v5  ;;  %v4026_v5 = vld [vmem:[#allocation7 + $0x204] ss:$8 sps:$4 sm:$0xff]  }
 0x1ec   : > { %1535 = vmatpush2.bf16.msra.mxu0 %v3953_v6  ;;  %v4024_v6 = vld [vmem:[#allocation7 + $0x200] ss:$8 sps:$4 sm:$0xff]  }
 0x1ed   : > { %1536 = vmatprep.subr.bf16.mxu0 %v3961_v13 }
 0x1ee   : > { %1858 = vmatpush2.bf16.msra.mxu1 %v3956_v17 }
 0x1ef   : > { %1859 = vmatprep.subr.bf16.mxu1 %v3964_v18 }
 0x1f0   : > { %1537 = vmatpush2.bf16.msra.mxu0 %v3959_v20 }
 0x1f1   : > { %1538 = vmatprep.subr.bf16.mxu0 %v3967_v21 }
 0x1f2   : > { %1860 = vmatpush2.bf16.msra.mxu1 %v3962_v14 }
 0x1f3   : > { %1861 = vmatprep.subr.bf16.mxu1 %v3970_v23 }
 0x1f4   : > { %1539 = vmatpush2.bf16.msra.mxu0 %v3965_v12 }
 0x1f5   : > { %1540 = vmatprep.subr.bf16.mxu0 %v3973_v24 }
 0x1f6   : > { %1862 = vmatpush2.bf16.msra.mxu1 %v3968_v25 }
 0x1f7   : > { %1863 = vmatprep.subr.bf16.mxu1 %v3976_v26 }
 0x1f8   : > { %1541 = vmatpush2.bf16.msra.mxu0 %v3971_v27 }
 0x1f9   : > { %1542 = vmatprep.subr.bf16.mxu0 %v3979_v28 }
 0x1fa   : > { %1864 = vmatpush2.bf16.msra.mxu1 %v3974_v15 }
 0x1fb   : > { %1865 = vmatprep.subr.bf16.mxu1 %v3982_v29 }
 0x1fc   : > { %1543 = vmatpush2.bf16.msra.mxu0 %v3977_v31 }
 0x1fd   : > { %1894 = vmatprep.subr.bf16.mxu0 %v3985_v32 }
 0x1fe   : > { %1866 = vmatpush2.bf16.msra.mxu1 %v3980_v33 }
 0x1ff   : > { %1545 = vmatmul.mubr.bf16.vlgmr.msra.gmra.mxu0 %v4722_v16  ;;  %1867 = vmatprep.subr.bf16.mxu1 %v3988_v10  ;;  %v3997_v16 = vld [vmem:[#allocation7 + $0x190] ss:$8 sps:$4 sm:$0xff]  }
 0x200   : > { %1895 = vmatpush1.bf16.msra.mxu0 %v3983_v34  ;;  %1914 = vmatprep.mubr.bf16.mxu0 %v4292_v0  ;;  %v1929_v10 = vld [vmem:[%s4981_s4] sm:$0x3] }
 0x201   : > { %1896 = vmatprep.subr.bf16.mxu0 %v3991_v35 }
 0x202   : > { %1868 = vmatpush2.bf16.msra.mxu1 %v3986_v36 }
 0x203   : > { %1869 = vmatprep.subr.bf16.mxu1 %v3994_v37 }
 0x204   : > { %1897 = vmatpush1.bf16.msra.mxu0 %v3989_v38 }
 0x205   : > { %2347 = vmatprep.subr.bf16.mxu0 %v3999_v43 }
 0x206   : > { %1870 = vmatpush2.bf16.msra.mxu1 %v3992_v42  ;;  %v1934_v42 = vrot.slane %v1929_v10, %v4625_v39 }
 0x207   : > { %3540 = vmatmul.mubr.msk.bf16.vlgmr.msra.gmra.mxu0 %vm1238_vm4, %v4733_v60  ;;  %v4011_v60 = vld [vmem:[#allocation7 + $0x154] ss:$8 sps:$4 sm:$0xff]  }
 0x208   : > { %2348 = vmatpush1.bf16.msra.mxu0 %v3997_v16 }
 0x209   : > { %1872 = vmatmul.mubr.bf16.vlgmr.msra.gmra.mxu1 %v4737_v11  ;;  %2349 = vmatprep.subr.bf16.mxu0 %v4002_v44  ;;  %v4009_v11 = vld [vmem:[#allocation7 + $0x150] ss:$8 sps:$4 sm:$0xff]  }
 0x20a   : > { %2422 = vmatprep.mubr.bf16.mxu1 %v4292_v0 }
 0x20c   : > { %2350 = vmatpush1.bf16.msra.mxu0 %v4000_v45 }
 0x20d   : > { %2351 = vmatprep.subr.bf16.mxu0 %v4005_v47 }
 0x210   : > { %2352 = vmatpush1.bf16.msra.mxu0 %v4003_v48 }
 0x211   : > { %2353 = vmatprep.subr.bf16.mxu0 %v4008_v49  ;;  %v1938_v49 = vrot.slane %v1929_v10, %v4630_v41 }
 0x214   : > { %2354 = vmatpush1.bf16.msra.mxu0 %v4006_v51 }
 0x215   : > { %2355 = vmatprep.subr.bf16.mxu0 %v4011_v60 }
 0x218   : > { %2356 = vmatpush1.bf16.msra.mxu0 %v4009_v11 }
 0x219   : > { %2357 = vmatprep.subr.bf16.mxu0 %v4014_v52 }
 0x21c   : > { %2358 = vmatpush1.bf16.msra.mxu0 %v4012_v54 }
 0x21d   : > { %2359 = vmatprep.subr.bf16.mxu0 %v4017_v55 }
 0x220   : > { %2360 = vmatpush1.bf16.msra.mxu0 %v4015_v56 }
 0x221   : > { %2361 = vmatprep.subr.bf16.mxu0 %v4020_v58 }
 0x224   : > { %2362 = vmatpush1.bf16.msra.mxu0 %v4018_v61 }
 0x225   : > { %2363 = vmatprep.subr.bf16.mxu0 %v4023_v3 }
 0x228   : > { %2364 = vmatpush2.bf16.msra.mxu0 %v4021_v4 }
 0x229   : > { %2365 = vmatprep.subr.bf16.mxu0 %v4026_v5 }
 0x22c   : > { %2366 = vmatpush2.bf16.msra.mxu0 %v4024_v6 }
 0x27f   : > { %v1319_v18 = vpop.f32.mrf.mxu0 }
 0x281   : > { %v1276_v13 = vpop.f32.mrf.mxu1  ;;  %v1321_v21 = vpop.f32.mrf.mxu0 }
 0x282   : > { %v1320_v29 = vadd.f32 %v1319_v18, %v1276_v13 }
 0x283   : > { %v1278_v17 = vpop.f32.mrf.mxu1  ;;  %v1323_v23 = vpop.f32.mrf.mxu0 }
 0x284   : > { %v1322_v32 = vadd.f32 %v1321_v21, %v1278_v17 }
 0x285   : > { %v1280_v20 = vpop.f32.mrf.mxu1  ;;  %v1325_v24 = vpop.f32.mrf.mxu0 }
 0x286   : > { %v1324_v36 = vadd.f32 %v1323_v23, %v1280_v20 }
 0x287   : > { %v1282_v14 = vpop.f32.mrf.mxu1 }
 0x288   : > { %v1326_v43 = vadd.f32 %v1325_v24, %v1282_v14  ;;  %v4029_v24 = vld [vmem:[#allocation7 + $0x1f4] ss:$8 sps:$4 sm:$0xff]  }
 0x289   : > { %v1589_v12 = vpop.f32.mrf.mxu1  ;;  %2367 = vmatprep.subr.bf16.mxu0 %v4029_v24 }
 0x28b   : > { %v1591_v25 = vpop.f32.mrf.mxu1 }
 0x28d   : > { %v1593_v28 = vpop.f32.mrf.mxu1 }
 0x28f   : > { %v1595_v34 = vpop.f32.mrf.mxu1 }
 0x2bf   : > { %v1546_v26 = vpop.f32.mrf.mxu0 }
 0x2c0   : > { %v1547_v33 = vadd.f32 %v1546_v26, %v1320_v29  ;;  %v4030_v29 = vld [vmem:[#allocation7 + $0x1e0] ss:$8 sps:$4 sm:$0xff]  }
 0x2c1   : > { %v1548_v27 = vpop.f32.mrf.mxu0 }
 0x2c2   : > { %v1549_v37 = vadd.f32 %v1548_v27, %v1322_v32  ;;  %v1590_v44 = vadd.f32 %v1589_v12, %v1547_v33  ;;  %v4027_v12 = vld [vmem:[#allocation7 + $0x1f0] ss:$8 sps:$4 sm:$0xff]  }
 0x2c3   : > { %v1550_v15 = vpop.f32.mrf.mxu0  ;;  %2368 = vmatpush2.bf16.msra.mxu0 %v4027_v12 }
 0x2c4   : > { %v1551_v45 = vadd.f32 %v1550_v15, %v1324_v36  ;;  %v1592_v60 = vadd.f32 %v1591_v25, %v1549_v37  ;;  %v4041_v36 = vld [vmem:[#allocation7 + $0x234] ss:$8 sps:$4 sm:$0xff]  }
 0x2c5   : > { %v1552_v31 = vpop.f32.mrf.mxu0  ;;  %2402 = vmatprep.subr.bf16.mxu1 %v4041_v36 }
 0x2c6   : > { %v1553_v11 = vadd.f32 %v1552_v31, %v1326_v43  ;;  %v1594_v56 = vadd.f32 %v1593_v28, %v1551_v45  ;;  %v4032_v31 = vld [vmem:[#allocation7 + $0x1e4] ss:$8 sps:$4 sm:$0xff]  }
 0x2c7   : > { %v1916_v35 = vpop.f32.mrf.mxu0  ;;  %2369 = vmatprep.subr.bf16.mxu0 %v4032_v31  ;;  %v4047_v43 = vld [vmem:[#allocation7 + $0x224] ss:$8 sps:$4 sm:$0xff]  }
 0x2c8   : > { %v1596_v6 = vadd.f32 %v1595_v34, %v1553_v11  ;;  %v4035_v34 = vld [vmem:[#allocation7 + $0x1d4] ss:$8 sps:$4 sm:$0xff]   ;;  %2370 = vmatpush2.bf16.msra.mxu0 %v4030_v29  ;;  %v4036_v11 = vld [vmem:[#allocation7 + $0x1c0] ss:$8 sps:$4 sm:$0xff]  }
 0x2c9   : > { %v1873_v38 = vpop.f32.mrf.mxu1  ;;  %v1918_v16 = vpop.f32.mrf.mxu0  ;;  %2371 = vmatprep.subr.bf16.mxu0 %v4035_v34 }
 0x2ca   : > { %v1917_v47 = vadd.f32 %v1916_v35, %v1873_v38  ;;  %v4039_v35 = vld [vmem:[#allocation7 + $0x230] ss:$8 sps:$4 sm:$0xff]  }
 0x2cb   : > { %v1875_v48 = vpop.f32.mrf.mxu1  ;;  %v1920_v51 = vpop.f32.mrf.mxu0  ;;  %2403 = vmatpush1.bf16.msra.mxu1 %v4039_v35 }
 0x2cc   : > { %v1925_v52 = vadd.f32 %v1917_v47, %v1590_v44  ;;  %v1919_v54 = vadd.f32 %v1918_v16, %v1875_v48  ;;  %v4038_v16 = vld [vmem:[#allocation7 + $0x1c4] ss:$8 sps:$4 sm:$0xff]   ;;  %v4045_v47 = vld [vmem:[#allocation7 + $0x220] ss:$8 sps:$4 sm:$0xff]   ;;  %2404 = vmatprep.subr.bf16.mxu1 %v4047_v43  ;;  %v4053_v48 = vld [vmem:[#allocation7 + $0x74] ss:$8 sps:$4 sm:$0xff]  }
 0x2cd   : > { %v1877_v55 = vpop.f32.mrf.mxu1  ;;  %v1922_v4 = vpop.f32.mrf.mxu0 }
 0x2ce   : > { %v1941_v58 = vadd.f32 %v1934_v42, %v1925_v52  ;;  %v1926_v61 = vadd.f32 %v1919_v54, %v1592_v60  ;;  %v1921_v3 = vadd.f32 %v1920_v51, %v1877_v55  ;;  %v4044_v52 = vld [vmem:[#allocation7 + $0x1b4] ss:$8 sps:$4 sm:$0xff]   ;;  %v4042_v55 = vld [vmem:[#allocation7 + $0x1b0] ss:$8 sps:$4 sm:$0xff]  }
 0x2cf   : > { %v1879_v5 = vpop.f32.mrf.mxu1  ;;  %2405 = vmatpush1.bf16.msra.mxu1 %v4045_v47 }
 0x2d0   : > { %v1942_v13 = vadd.f32 %v1938_v49, %v1926_v61  ;;  %v1927_v17 = vadd.f32 %v1921_v3, %v1594_v56  ;;  %v1923_v18 = vadd.f32 %v1922_v4, %v1879_v5  ;;  %v1945_v20 = vmax.f32 %v1941_v58, 0.0  ;;  %2617 = vmatprep.subr.bf16.mxu1 %v4053_v48  ;;  %v4050_v56 = vld [vmem:[#allocation7 + $0x1a4] ss:$8 sps:$4 sm:$0xff]   ;;  %v4048_v58 = vld [vmem:[#allocation7 + $0x1a0] ss:$8 sps:$4 sm:$0xff]  }
 0x2d1   : > { %v4059_v61 = vld [vmem:[#allocation7 + $0x114] ss:$8 sps:$4 sm:$0xff]   ;;  %v2015_v3 = vld [vmem:[#allocation3 + $0x8] sm:$0xf] }
 0x2d2   : > { %v1946_v21 = vmax.f32 %v1942_v13, 0.0  ;;  %v1943_v14 = vadd.f32 %v1934_v42, %v1927_v17  ;;  %v1928_v23 = vadd.f32 %v1923_v18, %v1596_v6  ;;  %v4033_v42 = vld [vmem:[#allocation7 + $0x1d0] ss:$8 sps:$4 sm:$0xff]   ;;  %v2012_v5 = vld [vmem:[#allocation3] sm:$0xff] }
 0x2d3   : > { %2372 = vmatpush2.bf16.msra.mxu0 %v4033_v42  ;;  %v2023_v18 = vld [vmem:[#allocation3 + $0x20] sm:$0x1] }
 0x2d4   : > { %v3669_v25 = vpack.c.bf16 %v1946_v21, %v1945_v20  ;;  %v1944_v26 = vadd.f32 %v1938_v49, %v1928_v23  ;;  %v1947_v27 = vmax.f32 %v1943_v14, 0.0  ;;  %2373 = vmatprep.subr.bf16.mxu0 %v4038_v16  ;;  %v2020_v21 = vld [vmem:[#allocation3 + $0x18] sm:$0x11] }
 0x2d5   : > { %v4051_v16 = vld [vmem:[#allocation7 + $0x70] ss:$8 sps:$4 sm:$0xff]  }
 0x2d6   : > { %v1948_v28 = vmax.f32 %v1944_v26, 0.0  ;;  %v1978_v15 = vshrl.u32 %v3669_v25, 16  ;;  %v1981_v10 = vshll.u32 %v3669_v25, 16 }
 0x2d7   : > { %2374 = vmatpush2.bf16.msra.mxu0 %v4036_v11 }
 0x2d8   : > { %v3670_v32 = vpack.c.bf16 %v1948_v28, %v1947_v27  ;;  %v1980_v33 = vrot.slane %v1978_v15, 7  ;;  %2375 = vmatprep.subr.bf16.mxu0 %v4044_v52 }
 0x2da   : > { %v1983_v37 = vor.u32 %v1981_v10, %v1980_v33  ;;  %v1986_v38 = vshrl.u32 %v3670_v32, 16  ;;  %v1989_v45 = vshll.u32 %v3670_v32, 16  ;;  %v1984_v51 = vrot.slane %v1980_v33, 4 }
 0x2db   : > { %2376 = vmatpush2.bf16.msra.mxu0 %v4042_v55 }
 0x2dc   : > { %1994 = vrot.lane.b32.xlu1 %v1983_v37, %s4293_s24  ;;  %v1988_v44 = vrot.slane %v1986_v38, 7  ;;  %2377 = vmatprep.subr.bf16.mxu0 %v4050_v56 }
 0x2de   : > { %v1993_v49 = vrot.slane %v1988_v44, 4  ;;  %v1991_v60 = vor.u32 %v1989_v45, %v1988_v44 }
 0x2df   : > { %2378 = vmatpush2.bf16.msra.mxu0 %v4048_v58  ;;  %v4057_v58 = vld [vmem:[#allocation7 + $0x110] ss:$8 sps:$4 sm:$0xff]  }
 0x2e0   : > { %1998 = vrot.lane.b32.xlu1 %v1993_v49, %s4293_s24  ;;  %v1992_v54 = vsel %vm4663_vm5, %v1984_v51, %v1991_v60  ;;  %2672 = vmatprep.subr.bf16.mxu0 %v4059_v61  ;;  %vm5030_vm5 = vmor %vm4617_vm9, %vm4611_vm0 }
 0x2e1   : > { %1996 = vrot.lane.b32.xlu0 %v1992_v54, %s4293_s24  ;;  %s3255_s24 = scalar_lea.sflag [#allocation6], %s418_s3 }
 0x34e   : > { %v1995_v4 = vpop.permute.xlu1 %1994 }
 0x34f   : > { %v2000_v6 = vrot.slane %v1995_v4, 4 }
 0x351   : > { %v2003_v30 = vsel %vm881_vm14, %v2000_v6, %v1995_v4  ;;  %v2016_v13 = vsel %vm4673_vm7, %v2000_v6, %v2015_v3  ;;  %v4063_v4 = vld [vmem:[#allocation7 + $0x64] ss:$8 sps:$4 sm:$0xff]  }
 0x352   : > { %v2013_v17 = vsel %vm5030_vm5, %v2003_v30, %v2012_v5  ;;  %2017 = vst [vmem:[#allocation3 + $0x8] sm:$0xf] %v2016_v13  ;;  %v1999_v20 = vpop.permute.xlu1 %1998  ;;  %v4066_v30 = vld [vmem:[#allocation7 + $0x104] ss:$8 sps:$4 sm:$0xff]  }
 0x353   : > { %2014 = vst [vmem:[#allocation3] sm:$0xff] %v2013_v17  ;;  %v2002_v14 = vrot.slane %v1999_v20, 4  ;;  %v1997_v23 = vpop.permute.xlu0 %1996 }
 0x354   : > { %v2001_v12 = vrot.slane %v1997_v23, 4 }
 0x355   : > { %v2005_v24 = vsel %vm881_vm14, %v2002_v14, %v1999_v20  ;;  %v2024_v40 = vsel %vm4692_vm12, %v2002_v14, %v2023_v18  ;;  %v4061_v20 = vld [vmem:[#allocation7 + $0x60] ss:$8 sps:$4 sm:$0xff]  }
 0x356   : > { %v2021_v19 = vsel %vm911_vm6, %v2005_v24, %v2020_v21  ;;  %2025 = vst [vmem:[#allocation3 + $0x20] sm:$0x1] %v2024_v40  ;;  %v2004_v22 = vsel %vm881_vm14, %v2001_v12, %v1997_v23  ;;  %2019 = vst.msk [vmem:[#allocation3 + $0x14] sm:$0xf] %vm833_vm10, %v2001_v12  ;;  %v4069_v21 = vld [vmem:[#allocation7 + $0x54] ss:$8 sps:$4 sm:$0xff]  }
 0x357   : > { %2022 = vst [vmem:[#allocation3 + $0x18] sm:$0x11] %v2021_v19  ;;  %2018 = vst.msk [vmem:[#allocation3 + $0xc] sm:$0xff] %vm4702_vm15, %v2004_v22  ;;  %v4064_v12 = vld [vmem:[#allocation7 + $0x100] ss:$8 sps:$4 sm:$0xff]  }
 0x358   : > { %vm5032_vm10 = vmmov %vm5029_vm2  ;;  %v4072_v24 = vld [vmem:[#allocation7 + $0x2b4] ss:$8 sps:$4 sm:$0xff]   ;;  %v4067_v40 = vld [vmem:[#allocation7 + $0x50] ss:$8 sps:$4 sm:$0xff]  }
 0x359   : > { %v2027_v25 = vld [vmem:[#allocation3 + $0x8] sm:$0xf] }
 0x35a   : > { %v2704_v32 = vld [vmem:[#allocation3 + $0x8] sm:$0xe]  ;;  %v2703_v51 = vld [vmem:[#allocation3] sm:$0xee] }
 0x35b   : > { %v4075_v19 = vld [vmem:[#allocation7 + $0x44] ss:$8 sps:$4 sm:$0xff]  }
 0x35d   : > { %v2029_v26 = vld [vmem:[#allocation3 + $0x14] sm:$0xf]  ;;  %v4055_v50 = vld [vmem:[#allocation3 + $0x20] ss:$0 sps:$4 sm:$0x11]  }
 0x35e   : > { %v4780_v27 = vcombine.low %v2027_v25, %v2029_v26  ;;  %v2028_v28 = vld [vmem:[#allocation3 + $0xc] sm:$0xff]  ;;  %v2066_v62 = vld [vmem:[#allocation3 + $0x18] sm:$0x11]  ;;  %v2158_v10 = vshll.u32 %v4055_v50, 16  ;;  %v3625_v34 = vcombine.low %v2704_v32, %v2029_v26  ;;  %v2757_v54 = vrot.slane %v4055_v50, 1 }
 0x35f   : > { %v3544_v15 = vcombine.high %v2013_v17, %v2028_v28  ;;  %v4782_v46 = vcombine.high %v2066_v62, %v2066_v62  ;;  %v4784_v29 = vcombine.low %v2013_v17, %v2028_v28  ;;  %v3546_v31 = vcombine.low %v2066_v62, %v2066_v62  ;;  %v4070_v26 = vld [vmem:[#allocation7 + $0x2b0] ss:$8 sps:$4 sm:$0xff]   ;;  %v4079_v50 = vld [vmem:[#allocation7 + $0x2a4] ss:$8 sps:$4 sm:$0xff]   ;;  %v4085_v32 = vld [vmem:[#allocation7 + $0x294] ss:$8 sps:$4 sm:$0xff]  }
 0x360   : > { %v2153_v33 = vshll.u32 %v4780_v27, 16  ;;  %v2151_v36 = vshrl.u32 %v4780_v27, 16  ;;  %v2160_v48 = vrot.slane %v2158_v10, 1  ;;  %v2756_v60 = vrot.slane %v3625_v34, 1  ;;  %v4083_v10 = vld [vmem:[#allocation7 + $0x290] ss:$8 sps:$4 sm:$0xff]  }
 0x361   : > { %v2141_v57 = vshll.u32 %v3544_v15, 16  ;;  %v2146_v35 = vshll.u32 %v4782_v46, 16  ;;  %v2129_v38 = vshll.u32 %v4784_v29, 16  ;;  %v2134_v42 = vshll.u32 %v3546_v31, 16  ;;  %v4091_v34 = vld [vmem:[#allocation7 + $0x284] ss:$8 sps:$4 sm:$0xff]  }
 0x362   : > { %v2155_v37 = vrot.slane %v2153_v33, 1  ;;  %v2139_v43 = vshrl.u32 %v3544_v15, 16  ;;  %v2127_v45 = vshrl.u32 %v4784_v29, 16  ;;  %v3623_v55 = vcombine.low %v2703_v51, %v2028_v28  ;;  %v4088_v33 = vld [vmem:[#allocation7 + $0x24] ss:$8 sps:$4 sm:$0xff]  }
 0x363   : > { %v2143_v44 = vrot.slane %v2141_v57, 1  ;;  %v2131_v49 = vrot.slane %v2129_v38, 1  ;;  %v2148_v52 = vrot.slane %v2146_v35, 1  ;;  %v2136_v3 = vrot.slane %v2134_v42, 1  ;;  %v4086_v57 = vld [vmem:[#allocation7 + $0x20] ss:$8 sps:$4 sm:$0xff]  }
 0x364   : > { %v2156_v47 = vor.u32 %v2155_v37, %v2151_v36  ;;  %v2751_v5 = vrot.slane %v3546_v31, 1  ;;  %v4795_v13 = vsel %vm5031_vm3, %v2756_v60, %v2757_v54  ;;  %v2750_v17 = vrot.slane %v3623_v55, 1  ;;  %v4077_v31 = vld [vmem:[#allocation7 + $0x2a0] ss:$8 sps:$4 sm:$0xff]   ;;  %v4097_v36 = vld [vmem:[#allocation7 + $0x274] ss:$8 sps:$4 sm:$0xff]  }
 0x365   : > { %v2144_v11 = vor.u32 %v2143_v44, %v2139_v43  ;;  %v2132_v61 = vor.u32 %v2131_v49, %v2127_v45  ;;  %v3624_v14 = vcombine.high %v2703_v51, %v2028_v28  ;;  %v2754_v25 = vrot.slane %v4782_v46, 1  ;;  %v4073_v28 = vld [vmem:[#allocation7 + $0x40] ss:$8 sps:$4 sm:$0xff]   ;;  %v4080_v46 = vld [vmem:[#allocation7 + $0x30] ss:$8 sps:$4 sm:$0xff]  }
 0x366   : > { %v2161_v56 = vsel %vm459_vm1, %v2156_v47, %v2160_v48  ;;  %v4799_v23 = vsel %vm5032_vm10, %v2750_v17, %v2751_v5  ;;  %v4089_v35 = vld [vmem:[#allocation7 + $0x280] ss:$8 sps:$4 sm:$0xff]   ;;  %v4092_v37 = vld [vmem:[#allocation7 + $0x10] ss:$8 sps:$4 sm:$0xff]   ;;  %v4100_v38 = vld [vmem:[#allocation7 + $0x4] ss:$8 sps:$4 sm:$0xff]  }
 0x367   : > { %3585 = vmatmul.mubr.msk.bf16.vlgmr.msra.gmra.mxu1 %vm1238_vm4, %v2161_v56  ;;  %v2149_v6 = vsel %vm459_vm1, %v2144_v11, %v2148_v52  ;;  %v2137_v18 = vsel %vm459_vm1, %v2132_v61, %v2136_v3  ;;  %v2753_v22 = vrot.slane %v3624_v14, 1  ;;  %vm5033_vm1 = vmmov %vm5029_vm2  ;;  %v4095_v42 = vld [vmem:[#allocation7 + $0x270] ss:$8 sps:$4 sm:$0xff]   ;;  %v4098_v43 = vld [vmem:[#allocation7] ss:$8 sps:$4 sm:$0xff]  }
 0x368   : > { %2618 = vmatpush1.bf16.msra.mxu1 %v4051_v16  ;;  %2379 = vmatprep.mubr.bf16.mxu0 %v2149_v6  ;;  %v4103_v16 = vld [vmem:[#allocation7 + $0x264] ss:$8 sps:$4 sm:$0xff]   ;;  %v4106_v44 = vld [vmem:[#allocation7 + $0xf4] ss:$8 sps:$4 sm:$0xff]   ;;  %v4101_v45 = vld [vmem:[#allocation7 + $0x260] ss:$8 sps:$4 sm:$0xff]  }
 0x369   : > { %2649 = vmatprep.mubr.bf16.mxu1 %v3544_v15  ;;  %2380 = vmatmul.mubr.bf16.vlgmr.msra.gmra.mxu0 %v2137_v18  ;;  %v2755_v62 = vsel %vm5033_vm1, %v2753_v22, %v2754_v25  ;;  %v4082_v15 = vld [vmem:[#allocation7 + $0x34] ss:$8 sps:$4 sm:$0xff]   ;;  %v4104_v48 = vld [vmem:[#allocation7 + $0xf0] ss:$8 sps:$4 sm:$0xff]   ;;  %v4112_v49 = vld [vmem:[#allocation7 + $0xe4] ss:$8 sps:$4 sm:$0xff]  }
 0x36a   : > { %2673 = vmatpush1.bf16.msra.mxu0 %v4057_v58  ;;  %2619 = vmatprep.subr.bf16.mxu1 %v4063_v4  ;;  %v4109_v47 = vld [vmem:[#allocation7 + $0x254] ss:$8 sps:$4 sm:$0xff]   ;;  %v4107_v51 = vld [vmem:[#allocation7 + $0x250] ss:$8 sps:$4 sm:$0xff]   ;;  %v4115_v60 = vld [vmem:[#allocation7 + $0x244] ss:$8 sps:$4 sm:$0xff]  }
 0x36b   : > { %2674 = vmatprep.subr.bf16.mxu0 %v4066_v30  ;;  %2692 = vmatprep.mubr.bf16.mxu0 %v4292_v0  ;;  %v4110_v11 = vld [vmem:[#allocation7 + $0xe0] ss:$8 sps:$4 sm:$0xff]   ;;  %v4118_v52 = vld [vmem:[#allocation7 + $0xd4] ss:$8 sps:$4 sm:$0xff]   ;;  %v4116_v56 = vld [vmem:[#allocation7 + $0xd0] ss:$8 sps:$4 sm:$0xff]  }
 0x36c   : > { %2620 = vmatpush1.bf16.msra.mxu1 %v4061_v20  ;;  %v4113_v54 = vld [vmem:[#allocation7 + $0x240] ss:$8 sps:$4 sm:$0xff]   ;;  %v4121_v55 = vld [vmem:[#allocation7 + $0x334] ss:$8 sps:$4 sm:$0xff]   ;;  %v4124_v58 = vld [vmem:[#allocation7 + $0xc4] ss:$8 sps:$4 sm:$0xff]  }
 0x36d   : > { %2621 = vmatprep.subr.bf16.mxu1 %v4069_v21  ;;  %v4119_v61 = vld [vmem:[#allocation7 + $0x330] ss:$8 sps:$4 sm:$0xff]   ;;  %v4127_v3 = vld [vmem:[#allocation7 + $0x324] ss:$8 sps:$4 sm:$0xff]   ;;  %v4122_v4 = vld [vmem:[#allocation7 + $0xc0] ss:$8 sps:$4 sm:$0xff]  }
 0x36e   : > { %2675 = vmatpush1.bf16.msra.mxu0 %v4064_v12  ;;  %v4130_v5 = vld [vmem:[#allocation7 + $0xb4] ss:$8 sps:$4 sm:$0xff]   ;;  %v4125_v6 = vld [vmem:[#allocation7 + $0x320] ss:$8 sps:$4 sm:$0xff]   ;;  %v4128_v17 = vld [vmem:[#allocation7 + $0xb0] ss:$8 sps:$4 sm:$0xff]  }
 0x36f   : > { %2944 = vmatprep.subr.bf16.mxu0 %v4072_v24  ;;  %v4133_v30 = vld [vmem:[#allocation7 + $0x314] ss:$8 sps:$4 sm:$0xff]   ;;  %v4136_v18 = vld [vmem:[#allocation7 + $0xa4] ss:$8 sps:$4 sm:$0xff]   ;;  %v4131_v20 = vld [vmem:[#allocation7 + $0x310] ss:$8 sps:$4 sm:$0xff]  }
 0x370   : > { %2622 = vmatpush1.bf16.msra.mxu1 %v4067_v40  ;;  %v4139_v21 = vld [vmem:[#allocation7 + $0x304] ss:$8 sps:$4 sm:$0xff]   ;;  %v4134_v14 = vld [vmem:[#allocation7 + $0xa0] ss:$8 sps:$4 sm:$0xff]   ;;  %v4142_v12 = vld [vmem:[#allocation7 + $0x94] ss:$8 sps:$4 sm:$0xff]  }
 0x371   : > { %3622 = vmatmul.mubr.msk.bf16.vlgmr.msra.gmra.mxu0 %vm1238_vm4, %v4780_v27  ;;  %2623 = vmatprep.subr.bf16.mxu1 %v4075_v19  ;;  %v4094_v27 = vld [vmem:[#allocation7 + $0x14] ss:$8 sps:$4 sm:$0xff]   ;;  %v4137_v24 = vld [vmem:[#allocation7 + $0x300] ss:$8 sps:$4 sm:$0xff]   ;;  %v4140_v19 = vld [vmem:[#allocation7 + $0x90] ss:$8 sps:$4 sm:$0xff]  }
 0x372   : > { %2945 = vmatpush1.bf16.msra.mxu0 %v4070_v26  ;;  %2976 = vmatprep.mubr.bf16.mxu0 %v2755_v62  ;;  %v4145_v40 = vld [vmem:[#allocation7 + $0x2f4] ss:$8 sps:$4 sm:$0xff]   ;;  %v4148_v22 = vld [vmem:[#allocation7 + $0x84] ss:$8 sps:$4 sm:$0xff]   ;;  %v4143_v25 = vld [vmem:[#allocation7 + $0x2f0] ss:$8 sps:$4 sm:$0xff]  }
 0x373   : > { %2946 = vmatprep.subr.bf16.mxu0 %v4079_v50  ;;  %v4151_v26 = vld [vmem:[#allocation7 + $0x2e4] ss:$8 sps:$4 sm:$0xff]   ;;  %v4146_v50 = vld [vmem:[#allocation7 + $0x80] ss:$8 sps:$4 sm:$0xff]  }
 0x374   : > { %2624 = vmatpush1.bf16.msra.mxu1 %v4073_v28  ;;  %v4154_v28 = vld [vmem:[#allocation7 + $0x354] ss:$8 sps:$4 sm:$0xff]   ;;  %v4149_v62 = vld [vmem:[#allocation7 + $0x2e0] ss:$8 sps:$4 sm:$0xff]  }
 0x375   : > { %2625 = vmatprep.subr.bf16.mxu1 %v4082_v15  ;;  %v4157_v15 = vld [vmem:[#allocation7 + $0x2d4] ss:$8 sps:$4 sm:$0xff]  }
 0x376   : > { %2947 = vmatpush1.bf16.msra.mxu0 %v4077_v31  ;;  %v4152_v31 = vld [vmem:[#allocation7 + $0x350] ss:$8 sps:$4 sm:$0xff]  }
 0x377   : > { %2948 = vmatprep.subr.bf16.mxu0 %v4085_v32  ;;  %v4160_v32 = vld [vmem:[#allocation7 + $0x344] ss:$8 sps:$4 sm:$0xff]  }
 0x378   : > { %2626 = vmatpush1.bf16.msra.mxu1 %v4080_v46  ;;  %v4155_v46 = vld [vmem:[#allocation7 + $0x2d0] ss:$8 sps:$4 sm:$0xff]  }
 0x379   : > { %2627 = vmatprep.subr.bf16.mxu1 %v4088_v33  ;;  %v4163_v33 = vld [vmem:[#allocation7 + $0x2c4] ss:$8 sps:$4 sm:$0xff]  }
 0x37a   : > { %2949 = vmatpush1.bf16.msra.mxu0 %v4083_v10  ;;  %v4158_v10 = vld [vmem:[#allocation7 + $0x340] ss:$8 sps:$4 sm:$0xff]  }
 0x37b   : > { %2950 = vmatprep.subr.bf16.mxu0 %v4091_v34  ;;  %v4161_v34 = vld [vmem:[#allocation7 + $0x2c0] ss:$8 sps:$4 sm:$0xff]  }
 0x37c   : > { %2628 = vmatpush1.bf16.msra.mxu1 %v4086_v57  ;;  %v3102_v57 = vld [vmem:[%s4984_s7 + $0xf0] sm:$0xff] }
 0x37d   : > { %2629 = vmatprep.subr.bf16.mxu1 %v4094_v27  ;;  %v3085_v27 = vld [vmem:[%s4984_s7 + $0x68] sm:$0xff] }
 0x37e   : > { %2951 = vmatpush1.bf16.msra.mxu0 %v4089_v35  ;;  %v3100_v35 = vld [vmem:[%s4984_s7 + $0xe0] sm:$0xff] }
 0x37f   : > { %2952 = vmatprep.subr.bf16.mxu0 %v4097_v36  ;;  %v3084_v36 = vld [vmem:[%s4984_s7 + $0x60] sm:$0xff] }
 0x380   : > { %2630 = vmatpush1.bf16.msra.mxu1 %v4092_v37  ;;  %v3099_v37 = vld [vmem:[%s4984_s7 + $0xd8] sm:$0xff] }
 0x381   : > { %2631 = vmatprep.subr.bf16.mxu1 %v4100_v38  ;;  %v3083_v38 = vld [vmem:[%s4984_s7 + $0x58] sm:$0xff] }
 0x382   : > { %2953 = vmatpush1.bf16.msra.mxu0 %v4095_v42  ;;  %v3098_v42 = vld [vmem:[%s4984_s7 + $0xd0] sm:$0xff] }
 0x383   : > { %2954 = vmatprep.subr.bf16.mxu0 %v4103_v16  ;;  %v3082_v16 = vld [vmem:[%s4984_s7 + $0x50] sm:$0xff] }
 0x384   : > { %2632 = vmatpush1.bf16.msra.mxu1 %v4098_v43  ;;  %v3097_v43 = vld [vmem:[%s4984_s7 + $0xc8] sm:$0xff] }
 0x385   : > { %2633 = vmatprep.subr.bf16.mxu1 %v4106_v44  ;;  %v3081_v44 = vld [vmem:[%s4984_s7 + $0x48] sm:$0xff] }
 0x386   : > { %2955 = vmatpush1.bf16.msra.mxu0 %v4101_v45  ;;  %v3096_v45 = vld [vmem:[%s4984_s7 + $0xc0] sm:$0xff] }
 0x387   : > { %2956 = vmatprep.subr.bf16.mxu0 %v4109_v47  ;;  %v3080_v47 = vld [vmem:[%s4984_s7 + $0x40] sm:$0xff] }
 0x388   : > { %2634 = vmatpush2.bf16.msra.mxu1 %v4104_v48  ;;  %v3095_v48 = vld [vmem:[%s4984_s7 + $0xb8] sm:$0xff] }
 0x389   : > { %2635 = vmatprep.subr.bf16.mxu1 %v4112_v49  ;;  %v3079_v49 = vld [vmem:[%s4984_s7 + $0x38] sm:$0xff] }
 0x38a   : > { %2957 = vmatpush1.bf16.msra.mxu0 %v4107_v51  ;;  %v3094_v51 = vld [vmem:[%s4984_s7 + $0xb0] sm:$0xff] }
 0x38b   : > { %2958 = vmatprep.subr.bf16.mxu0 %v4115_v60  ;;  %v3078_v60 = vld [vmem:[%s4984_s7 + $0x30] sm:$0xff] }
 0x38c   : > { %2636 = vmatpush2.bf16.msra.mxu1 %v4110_v11  ;;  %v3093_v11 = vld [vmem:[%s4984_s7 + $0xa8] sm:$0xff] }
 0x38d   : > { %2637 = vmatprep.subr.bf16.mxu1 %v4118_v52  ;;  %v3077_v52 = vld [vmem:[%s4984_s7 + $0x28] sm:$0xff] }
 0x38e   : > { %2959 = vmatpush1.bf16.msra.mxu0 %v4113_v54  ;;  %v3092_v54 = vld [vmem:[%s4984_s7 + $0xa0] sm:$0xff] }
 0x38f   : > { %2960 = vmatprep.subr.bf16.mxu0 %v4121_v55  ;;  %v3076_v55 = vld [vmem:[%s4984_s7 + $0x20] sm:$0xff] }
 0x390   : > { %2638 = vmatpush2.bf16.msra.mxu1 %v4116_v56  ;;  %v3091_v56 = vld [vmem:[%s4984_s7 + $0x98] sm:$0xff] }
 0x391   : > { %2639 = vmatprep.subr.bf16.mxu1 %v4124_v58  ;;  %v3075_v58 = vld [vmem:[%s4984_s7 + $0x18] sm:$0xff] }
 0x392   : > { %2961 = vmatpush2.bf16.msra.mxu0 %v4119_v61  ;;  %v3090_v61 = vld [vmem:[%s4984_s7 + $0x90] sm:$0xff] }
 0x393   : > { %2962 = vmatprep.subr.bf16.mxu0 %v4127_v3  ;;  %v3074_v3 = vld [vmem:[%s4984_s7 + $0x10] sm:$0xff] }
 0x394   : > { %2640 = vmatpush2.bf16.msra.mxu1 %v4122_v4  ;;  %v3089_v4 = vld [vmem:[%s4984_s7 + $0x88] sm:$0xff] }
 0x395   : > { %2641 = vmatprep.subr.bf16.mxu1 %v4130_v5  ;;  %v3073_v5 = vld [vmem:[%s4984_s7 + $0x8] sm:$0xff] }
 0x396   : > { %2963 = vmatpush2.bf16.msra.mxu0 %v4125_v6  ;;  %v3088_v6 = vld [vmem:[%s4984_s7 + $0x80] sm:$0xff] }
 0x397   : > { %2964 = vmatprep.subr.bf16.mxu0 %v4133_v30  ;;  %v3177_v30 = vld [vmem:[%s4985_s8 + $0x8] sm:$0xff] }
 0x398   : > { %2642 = vmatpush2.bf16.msra.mxu1 %v4128_v17  ;;  %v3072_v17 = vld [vmem:[%s4984_s7] sm:$0xff] }
 0x399   : > { %2643 = vmatprep.subr.bf16.mxu1 %v4136_v18  ;;  %v4294_v18 = vmov 0.0  }
 0x39a   : > { %2965 = vmatpush2.bf16.msra.mxu0 %v4131_v20 }
 0x39b   : > { %2966 = vmatprep.subr.bf16.mxu0 %v4139_v21 }
 0x39c   : > { %2644 = vmatpush2.bf16.msra.mxu1 %v4134_v14 }
 0x39d   : > { %2645 = vmatprep.subr.bf16.mxu1 %v4142_v12 }
 0x39e   : > { %2967 = vmatpush2.bf16.msra.mxu0 %v4137_v24 }
 0x39f   : > { %2968 = vmatprep.subr.bf16.mxu0 %v4145_v40 }
 0x3a0   : > { %2646 = vmatpush2.bf16.msra.mxu1 %v4140_v19 }
 0x3a1   : > { %2647 = vmatprep.subr.bf16.mxu1 %v4148_v22 }
 0x3a2   : > { %2969 = vmatpush2.bf16.msra.mxu0 %v4143_v25 }
 0x3a3   : > { %2970 = vmatprep.subr.bf16.mxu0 %v4151_v26 }
 0x3a4   : > { %2648 = vmatpush2.bf16.msra.mxu1 %v4146_v50 }
 0x3a5   : > { %2999 = vmatprep.subr.bf16.mxu1 %v4154_v28 }
 0x3a6   : > { %2971 = vmatpush2.bf16.msra.mxu0 %v4149_v62 }
 0x3a7   : > { %2650 = vmatmul.mubr.bf16.vlgmr.msra.gmra.mxu1 %v4784_v29  ;;  %2972 = vmatprep.subr.bf16.mxu0 %v4157_v15  ;;  %v3103_v29 = vld [vmem:[%s4984_s7 + $0xf8] sm:$0xff] }
 0x3a8   : > { %3000 = vmatpush1.bf16.msra.mxu1 %v4152_v31  ;;  %3019 = vmatprep.mubr.bf16.mxu1 %v4292_v0  ;;  %v3087_v0 = vld [vmem:[%s4984_s7 + $0x78] sm:$0xff] }
 0x3a9   : > { %3001 = vmatprep.subr.bf16.mxu1 %v4160_v32 }
 0x3aa   : > { %2973 = vmatpush2.bf16.msra.mxu0 %v4155_v46 }
 0x3ab   : > { %2974 = vmatprep.subr.bf16.mxu0 %v4163_v33 }
 0x3ac   : > { %3002 = vmatpush1.bf16.msra.mxu1 %v4158_v10  ;;  %v3034_v10 = vld [vmem:[%s4983_s6] sm:$0x3] }
 0x3ad   : > { %3671 = vmatprep.subr.mxu1 %v3103_v29 }
 0x3ae   : > { %2975 = vmatpush2.bf16.msra.mxu0 %v4161_v34 }
 0x3af   : > { %3662 = vmatmul.mubr.msk.bf16.vlgmr.msra.gmra.mxu1 %vm1238_vm4, %v4795_v13  ;;  %v3086_v13 = vld [vmem:[%s4984_s7 + $0x70] sm:$0xff]  ;;  %3709 = vmatprep.subr.mxu0 %v4294_v18 }
 0x3b0   : > { %3672 = vmatpush3.msra.mxu1 %v3087_v0 }
 0x3b1   : > { %2977 = vmatmul.mubr.bf16.vlgmr.msra.gmra.mxu0 %v4799_v23  ;;  %3673 = vmatprep.subr.mxu1 %v3102_v57  ;;  %v3101_v23 = vld [vmem:[%s4984_s7 + $0xe8] sm:$0xff] }
 0x3b2   : > { %3674 = vmatpush3.msra.mxu1 %v3086_v13  ;;  %3710 = vmatpush3.msra.mxu0 %v3177_v30 }
 0x3b3   : > { %3675 = vmatprep.subr.mxu1 %v3101_v23  ;;  %3711 = vmatprep.subr.mxu0 %v4294_v18  ;;  %v3039_v23 = vrot.slane %v3034_v10, %v4625_v39 }
 0x3b4   : > { %3676 = vmatpush3.msra.mxu1 %v3085_v27  ;;  %3712 = vmatpush3.msra.mxu0 %v3176_v7 }
 0x3b5   : > { %3677 = vmatprep.subr.mxu1 %v3100_v35  ;;  %3713 = vmatprep.mubr.msk.f32.mxu0 %vm4295_vm11, %v4294_v18 }
 0x3b6   : > { %3678 = vmatpush3.msra.mxu1 %v3084_v36 }
 0x3b7   : > { %3679 = vmatprep.subr.mxu1 %v3099_v37 }
 0x3b8   : > { %3680 = vmatpush3.msra.mxu1 %v3083_v38 }
 0x3b9   : > { %3681 = vmatprep.subr.mxu1 %v3098_v42 }
 0x3ba   : > { %3682 = vmatpush3.msra.mxu1 %v3082_v16  ;;  %v3043_v16 = vrot.slane %v3034_v10, %v4630_v41 }
 0x3bb   : > { %3683 = vmatprep.subr.mxu1 %v3097_v43 }
 0x3bc   : > { %3684 = vmatpush3.msra.mxu1 %v3081_v44 }
 0x3bd   : > { %3685 = vmatprep.subr.mxu1 %v3096_v45 }
 0x3be   : > { %3686 = vmatpush3.msra.mxu1 %v3080_v47 }
 0x3bf   : > { %3687 = vmatprep.subr.mxu1 %v3095_v48 }
 0x3c0   : > { %3688 = vmatpush3.msra.mxu1 %v3079_v49 }
 0x3c1   : > { %3689 = vmatprep.subr.mxu1 %v3094_v51 }
 0x3c2   : > { %3690 = vmatpush3.msra.mxu1 %v3078_v60 }
 0x3c3   : > { %3691 = vmatprep.subr.mxu1 %v3093_v11 }
 0x3c4   : > { %3692 = vmatpush3.msra.mxu1 %v3077_v52 }
 0x3c5   : > { %3693 = vmatprep.subr.mxu1 %v3092_v54 }
 0x3c6   : > { %3694 = vmatpush3.msra.mxu1 %v3076_v55 }
 0x3c7   : > { %3695 = vmatprep.subr.mxu1 %v3091_v56 }
 0x3c8   : > { %3696 = vmatpush3.msra.mxu1 %v3075_v58 }
 0x3c9   : > { %3697 = vmatprep.subr.mxu1 %v3090_v61 }
 0x3ca   : > { %3698 = vmatpush3.msra.mxu1 %v3074_v3 }
 0x3cb   : > { %3699 = vmatprep.subr.mxu1 %v3089_v4 }
 0x3cc   : > { %3700 = vmatpush3.msra.mxu1 %v3073_v5 }
 0x3cd   : > { %3701 = vmatprep.subr.mxu1 %v3088_v6 }
 0x3ce   : > { %3702 = vmatpush3.msra.mxu1 %v3072_v17 }
 0x427   : > { %v2424_v14 = vpop.f32.mrf.mxu1 }
 0x429   : > { %v2381_v20 = vpop.f32.mrf.mxu0  ;;  %v2426_v24 = vpop.f32.mrf.mxu1 }
 0x42a   : > { %v2425_v31 = vadd.f32 %v2424_v14, %v2381_v20 }
 0x42b   : > { %v2383_v21 = vpop.f32.mrf.mxu0  ;;  %v2428_v19 = vpop.f32.mrf.mxu1 }
 0x42c   : > { %v2427_v46 = vadd.f32 %v2426_v24, %v2383_v21 }
 0x42d   : > { %v2385_v12 = vpop.f32.mrf.mxu0  ;;  %v2430_v25 = vpop.f32.mrf.mxu1 }
 0x42e   : > { %v2429_v0 = vadd.f32 %v2428_v19, %v2385_v12 }
 0x42f   : > { %v2387_v40 = vpop.f32.mrf.mxu0 }
 0x430   : > { %v2431_v35 = vadd.f32 %v2430_v25, %v2387_v40 }
 0x431   : > { %v2694_v22 = vpop.f32.mrf.mxu0 }
 0x433   : > { %v2696_v26 = vpop.f32.mrf.mxu0 }
 0x435   : > { %v2698_v62 = vpop.f32.mrf.mxu0 }
 0x437   : > { %v2700_v34 = vpop.f32.mrf.mxu0 }
 0x467   : > { %v2651_v50 = vpop.f32.mrf.mxu1 }
 0x468   : > { %v2652_v33 = vadd.f32 %v2651_v50, %v2425_v31 }
 0x469   : > { %v2653_v28 = vpop.f32.mrf.mxu1 }
 0x46a   : > { %v2654_v57 = vadd.f32 %v2653_v28, %v2427_v46  ;;  %v2695_v36 = vadd.f32 %v2694_v22, %v2652_v33  ;;  %v3178_v46 = vld [vmem:[%s4986_s9] sm:$0x1] }
 0x46b   : > { %v2655_v15 = vpop.f32.mrf.mxu1 }
 0x46c   : > { %v2656_v37 = vadd.f32 %v2655_v15, %v2429_v0  ;;  %v2697_v44 = vadd.f32 %v2696_v26, %v2654_v57  ;;  %v3174_v15 = vld [vmem:[%s427_s14] sm:$0x1]  ;;  %s4224_s14 = scalar_lea.vmem %s4223_s21, 32 }
 0x46d   : > { %v2657_v32 = vpop.f32.mrf.mxu1  ;;  %p4226_p0 = scmp.lt.s32.totalorder %s4224_s14, %s4218_s25 }
 0x46e   : > { %v2658_v45 = vadd.f32 %v2657_v32, %v2431_v35  ;;  %v2699_v51 = vadd.f32 %v2698_v62, %v2656_v37 }
 0x46f   : > { %v3021_v29 = vpop.f32.mrf.mxu1  ;;  %p4227_p1 = por %p4226_p0, %p4225_p11 }
 0x470   : > { %v2701_v55 = vadd.f32 %v2700_v34, %v2658_v45 }
 0x471   : > { %v2978_v13 = vpop.f32.mrf.mxu0  ;;  %v3023_v27 = vpop.f32.mrf.mxu1  ;;  %p4228_p3 = pnand %p4227_p1, %p4221_p8 }
 0x472   : > { %v3022_v38 = vadd.f32 %v3021_v29, %v2978_v13 }
 0x473   : > { %v2980_v42 = vpop.f32.mrf.mxu0  ;;  %v3025_v43 = vpop.f32.mrf.mxu1 }
 0x474   : > { %v3030_v47 = vadd.f32 %v3022_v38, %v2695_v36  ;;  %v3024_v48 = vadd.f32 %v3023_v27, %v2980_v42 }
 0x475   : > { %v2982_v49 = vpop.f32.mrf.mxu0  ;;  %v3027_v54 = vpop.f32.mrf.mxu1 }
 0x476   : > { %v3046_v60 = vadd.f32 %v3039_v23, %v3030_v47  ;;  %v3031_v11 = vadd.f32 %v3024_v48, %v2697_v44  ;;  %v3026_v52 = vadd.f32 %v3025_v43, %v2982_v49 }
 0x477   : > { %v2984_v39 = vpop.f32.mrf.mxu0 }
 0x478   : > { %v3047_v56 = vadd.f32 %v3043_v16, %v3031_v11  ;;  %v3032_v58 = vadd.f32 %v3026_v52, %v2699_v51  ;;  %v3028_v61 = vadd.f32 %v3027_v54, %v2984_v39  ;;  %v3050_v3 = vadd.f32 %v3046_v60, %v802_v63 }
 0x47a   : > { %v3048_v41 = vadd.f32 %v3039_v23, %v3032_v58  ;;  %v3033_v4 = vadd.f32 %v3028_v61, %v2701_v55  ;;  %v3051_v5 = vadd.f32 %v3047_v56, %v803_v1  ;;  %v3054_v17 = vmax.f32 %v3050_v3, 0.0 }
 0x47c   : > { %v3052_v6 = vadd.f32 %v3048_v41, %v804_v8  ;;  %v3049_v30 = vadd.f32 %v3043_v16, %v3033_v4  ;;  %v3055_v14 = vmax.f32 %v3051_v5, 0.0 }
 0x47e   : > { %v3056_v20 = vmax.f32 %v3052_v6, 0.0  ;;  %v3053_v21 = vadd.f32 %v3049_v30, %v805_v9 }
 0x480   : > { %v3058_v12 = vadd.f32 %v3056_v20, %v3054_v17  ;;  %v3057_v24 = vmax.f32 %v3053_v21, 0.0 }
 0x482   : > { %v3059_v40 = vrot.slane %v3058_v12, 4  ;;  %v3065_v53 = vadd.f32 %v3057_v24, %v3055_v14 }
 0x484   : > { %v3060_v63 = vadd.f32 %v3059_v40, %v3058_v12  ;;  %v3066_v19 = vrot.slane %v3065_v53, 4 }
 0x486   : > { %v3067_v22 = vadd.f32 %v3066_v19, %v3065_v53  ;;  %v3061_v59 = vrot.slane %v3060_v63, 2 }
 0x488   : > { %v3068_v1 = vrot.slane %v3067_v22, 2  ;;  %v3062_v25 = vadd.f32 %v3061_v59, %v3060_v63 }
 0x48a   : > { %v3069_v2 = vadd.f32 %v3068_v1, %v3067_v22  ;;  %v3063_v8 = vrot.slane %v3062_v25, 1 }
 0x48c   : > { %v3070_v26 = vrot.slane %v3069_v2, 1  ;;  %v3064_v28 = vadd.f32 %v3063_v8, %v3062_v25 }
 0x48e   : > { %v3071_v50 = vadd.f32 %v3070_v26, %v3069_v2 }
 0x490   : > { %3168 = vmatprep.mubr.f32.mxu1 %v3071_v50 }
 0x491   : > { %3169 = vmatmul.mubr.f32.vlgmr.msra.gmra.mxu1 %v3064_v28 }
 0x551   : > { %v3703_v9 = vpop.f32.mrf.mxu1 }
 0x553   : > { %v3704_v62 = vpop.f32.mrf.mxu1 }
 0x554   : > { %v3705_v31 = vadd.f32 %v3704_v62, %v3703_v9 }
 0x556   : > { %v3175_v32 = vmul.f32 %v3705_v31, %v3174_v15 }
 0x558   : > { %3714 = vmatmul.mubr.msk.f32.vlgmr.msra.gmra.mxu0 %vm881_vm14, %v3175_v32 }
 0x618   : > { %v3249_v18 = vpop.f32.mrf.mxu0 }
 0x619   : > { %v3250_v33 = vadd.f32 %v3249_v18, %v3178_v46 }
 0x61a   : > { %v3715_v10 = vpop.f32.mrf.mxu0 }
 0x61b   : > { %3253 = vst [vmem:[%s419_s29] sm:$0x1] %v3250_v33 }
 0x61c   : > { %4231 = shalt.err (!%p4228_p3)
}
 0x61d   : > { %s4232_s16 = scalar_lea.hbm %s4942_s22, 16  ;;  %s4236_s12 = scalar_lea.hbm %s4988_s11, 32 }
 0x61e   : > { %p4233_p2 = scmp.ne.s32.totalorder %s4942_s22, %s4232_s16  ;;  %p4237_p7 = scmp.lt.s32.totalorder %s4942_s22, %s4988_s11 }
 0x61f   : > { %p4238_p6 = scmp.lt.s32.totalorder %s4236_s12, %s4232_s16 }
 0x620   : > { %p4234_p4 = pnand %p4233_p2, %p4395_p5 }
 0x621   : > { %p4239_p9 = por %p4238_p6, %p4237_p7 }
 0x622   : > { %p4235_p13 = pneg %p4234_p4 }
 0x624   : > { %p4240_p10 = pnand %p4239_p9, %p4235_p13 }
 0x626   : > { %4243 = shalt.err (!%p4240_p10)
}
 0x627   : > { %3725 = dma.vmem_to_hbm [thread:$0]  (%p4395_p5), %s3268_s13, 16, %s4942_s22, %s3255_s24  }
 0x628 PF: > { %p3742_p12 = scmp.ge.s32.totalorder %s4286_s20, 2  ;;  %s3279_s15 = sand.u32 1, %s4274_s17  }
 0x629   : > { %p5034_p8 = scmp.ne.s32.totalorder %s4996_s28, 0  ;;  %s3280_s25 = scalar_lea.sflag [#allocation6], %s3279_s15 }
 0x62b   : > { %p3735_p11 = pnand %p3742_p12, %p5034_p8 }
 0x62d   : > { %p3736_p0 = pneg %p3735_p11 }
 0x62f   : > { %4269 = dma.done.wait (%p3736_p0), %s3280_s25, 16  }
 0x630   : > { %4271 = vsyncadd (%p3736_p0), %s3280_s25, 4294967280  ;;  %s5035_s30 = sld [smem:[#allocation13_spill]]  ;;  %p23_p1 = scmp.ge.s32.totalorder %s4382_s23, 4  }
 0x631   : > { %s5036_s17 = smov %s4278_s18  ;;  %s5037_s18 = smov %s4282_s19 }
 0x632   : > { %s5039_s20 = smov %s4382_s23  ;;  %25 = sbr.rel (!%p23_p1) target bundleno = 8 (0x8), region = 117 }
 0x636   : > { %s5038_s19 = smov %s5035_s30 }
 0x637   :  { %3284 = vsyncpa [#allocation5], 1 }
 0x638   :  { %3286 = vsyncpa [#allocation5 + $0x1], 1 }
 0x639   :  { %3287 = vsyncpa [#allocation8], 1 }
 0x63a   :  { %3288 = vsyncpa [#allocation6], 1 }
 0x63b   :  { %3290 = vsyncpa [#allocation6 + $0x1], 1 }

</bundles_post_ra>
